<compile_context>
chip_gen: v7x
topology: tpu7x:2x2x1
jax: 0.10.0
libtpu: 0.0.40
codegen_flags: <defaults>
</compile_context>

<pallas_src>
import jax
import jax.numpy as jnp
from jax.experimental import pallas as pl
from jax.experimental.pallas import tpu as pltpu

_LANES = 128
_VMEM_LIMIT_BYTES = 32 << 20  # v6e/v7x default scoped VMEM; raises v5e's 16 MiB.


def _pos_add_seq_kernel(x_ref, pos_ref, o_ref):
    # x_ref / o_ref: (tr, 128) tile of one batch element (batch dim squeezed).
    # pos_ref:       (tr, 128) matching tile of the learned positional encoding.
    # Layouts match exactly -> straight matched-layout VALU add, no broadcast.
    o_ref[...] = x_ref[...] + pos_ref[...]


def _pos_add_batch_kernel(x_ref, pos_ref, o_ref):
    # x_ref / o_ref: (tb, R, 128) tile spanning several batch elements.
    # pos_ref:       (R, 128), broadcast over the batch tile (one broadcast per
    # grid step, hoisted outside any inner loop).
    o_ref[...] = x_ref[...] + pos_ref[...][None, :, :]


def _round_down(v, m):
    return max(m, (v // m) * m)


def _prefer_dividing_tile(total, tile, step, max_probes=64):
    """Largest multiple of `step` <= tile that divides `total`, if one is nearby.

    Falls back to `tile` (Pallas masks the partial tail tile, which is correct
    but slightly slower) when no nearby divisor exists.
    """
    tile = min(tile, total)
    tile = _round_down(tile, step)
    t = tile
    for _ in range(max_probes):
        if t < step:
            break
        if total % t == 0:
            return t
        t -= step
    return tile


def quant_learned_positional_encoding(
    x,
    pos,
    *,
    target_tile_bytes=4 << 20,   # ~4 MiB x-tiles amortize the ~0.35 us/step cost
    min_kernel_bytes=256 << 10,  # below this, XLA's fused add beats a kernel launch
    min_grid_steps=8,            # keep the pipeline busy (and both v7x TCs fed)
):
    """out[b, s, e] = x[b, s, e] + pos[s, e].   x: [B, S, E], pos: [S, E].

    TODO(synk): brevitas input_quant/output_quant fake-quant steps are identity
    here (no quantizer config supplied); only the eltwise-add hot path is Pallas.
    """
    B, S, E = x.shape
    assert pos.shape == (S, E)
    F = S * E
    itemsize = jnp.dtype(x.dtype).itemsize

    # Fallbacks: S*E not lane-divisible (would force masked partial stores), or
    # the whole tensor is so small that pallas_call launch + pipeline
    # prologue/epilogue (~us) exceeds the fused XLA add.
    if F % _LANES != 0 or B * F * itemsize < min_kernel_bytes:
        return x + pos[None, :, :]

    # Lane-dense reshape: (S, E) -> (R, 128). Free (bitcast-level) in XLA and
    # guarantees every vector store uses all 128 lanes even for small E.
    R = F // _LANES
    x2 = x.reshape(B, R, _LANES)
    pos2 = pos.reshape(R, _LANES)

    # Native sublane packing: 8 rows for 32-bit, 16 for bf16, 32 for int8/fp8.
    sublane = 8 if itemsize >= 4 else 32 // itemsize
    bytes_per_row = _LANES * itemsize
    rows_target = _round_down(
        max(sublane, target_tile_bytes // bytes_per_row), sublane)

    if R > rows_target:
        # --- Sequence-tiled path: batch squeezed out of the kernel refs. ------
        tr = rows_target
        # Cap tr so the grid keeps >= min_grid_steps steps (pipeline overlap and
        # the 2-TensorCore megacore split on v7x both need a few steps per core).
        steps_along_r = -(-min_grid_steps // B)  # ceil
        if -(-R // tr) < steps_along_r:
            tr = _round_down(R // steps_along_r, sublane)
        # Prefer tr dividing R so the tail tile isn't a masked partial store.
        tr = _prefer_dividing_tile(R, tr, sublane)
        num_r = pl.cdiv(R, tr)

        out2 = pl.pallas_call(
            _pos_add_seq_kernel,
            out_shape=jax.ShapeDtypeStruct((B, R, _LANES), x.dtype),
            # Seq-tile axis outermost, batch innermost: pos's block index depends
            # only on the seq tile, so its HBM fetch is skipped for B-1 of every
            # B consecutive grid steps.
            grid=(num_r, B),
            in_specs=[
                pl.BlockSpec((None, tr, _LANES), lambda r, b: (b, r, 0)),  # x
                pl.BlockSpec((tr, _LANES), lambda r, b: (r, 0)),           # pos
            ],
            out_specs=pl.BlockSpec((None, tr, _LANES), lambda r, b: (b, r, 0)),
            compiler_params=pltpu.CompilerParams(
                dimension_semantics=("parallel", "parallel"),
                # 2 * (x + out + pos) tiles <= 6 * 4 MiB = 24 MiB; 32 MiB keeps
                # headroom and raises v5e's 16 MiB default (no-op on v6e/v7x).
                vmem_limit_bytes=_VMEM_LIMIT_BYTES,
            ),
        )(x2, pos2)
    else:
        # --- Batch-tiled path (small S*E, possibly large B). -------------------
        # Blocking the batch in tiles of tb keeps every grid step's DMA at
        # ~1-4 MiB instead of degenerating into tiny per-step transfers.
        row_block_bytes = R * bytes_per_row
        tb = min(B, max(1, target_tile_bytes // row_block_bytes))
        if pl.cdiv(B, tb) < min_grid_steps:
            # Trade a few steps back, but never drop a step below ~1 MiB of DMA.
            tb_floor = max(1, (1 << 20) // row_block_bytes)
            tb = min(B, max(tb_floor, B // min_grid_steps, 1))
        tb = _prefer_dividing_tile(B, tb, 1, max_probes=32)
        num_b = pl.cdiv(B, tb)

        out2 = pl.pallas_call(
            _pos_add_batch_kernel,
            out_shape=jax.ShapeDtypeStruct((B, R, _LANES), x.dtype),
            grid=(num_b,),
            in_specs=[
                pl.BlockSpec((tb, R, _LANES), lambda b: (b, 0, 0)),   # x
                pl.BlockSpec((R, _LANES), lambda b: (0, 0)),          # pos (fetched once)
            ],
            out_specs=pl.BlockSpec((tb, R, _LANES), lambda b: (b, 0, 0)),
            compiler_params=pltpu.CompilerParams(
                dimension_semantics=("parallel",),
                vmem_limit_bytes=_VMEM_LIMIT_BYTES,
            ),
        )(x2, pos2)

    return out2.reshape(B, S, E)


if __name__ == "__main__":
    key = jax.random.PRNGKey(0)

    def check(B, S, E):
        kx, kpos = jax.random.split(jax.random.fold_in(key, B * 1000003 + S * 1009 + E))
        x = jax.random.normal(kx, (B, S, E), dtype=jnp.float32)
        # Parameter init: torch.nn.init.normal_(self.pos, mean=0, std=1)
        pos = jax.random.normal(kpos, (S, E), dtype=jnp.float32)
        out = jax.block_until_ready(quant_learned_positional_encoding(x, pos))
        ref = x + pos[None, :, :]
        assert out.shape == (B, S, E)
        assert jnp.allclose(out, ref, atol=1e-6, rtol=1e-6), (B, S, E)

    # Module-consistent small shape (batch=2, seq_len=8, emb_dim=32): goes
    # through the tiny-input fallback (kernel launch would dominate).
    check(2, 8, 32)
    # Batch-tiled Pallas path (small S*E): grid over batch, broadcast add.
    check(4, 512, 256)
    # Sequence-tiled Pallas path (large S*E): batch-squeezed tiles over R.
    check(2, 4096, 512)

    print("KERNEL_OK")
</pallas_src>

<mosaic_0001>
module attributes {stable_mosaic.version = 11 : i64} {
  func.func @_pos_add_batch_kernel(%arg0: i32, %arg1: memref<2x1024x128xf32, #tpu.memory_space<vmem>>, %arg2: memref<1024x128xf32, #tpu.memory_space<vmem>>, %arg3: memref<2x1024x128xf32, #tpu.memory_space<vmem>>) attributes {dimension_semantics = [#tpu.dimension_semantics<parallel>], iteration_bounds = array<i64: 2>, scalar_prefetch = 0 : i64, scratch_operands = 0 : i64, tpu.core_type = #tpu.core_type<tc>, window_params = [{transform_indices = @transform_0, window_bounds = array<i64: 2, 1024, 128>}, {pipeline_mode = #tpu.pipeline_mode<synchronous>, transform_indices = @transform_1, window_bounds = array<i64: 1024, 128>}, {transform_indices = @transform_2, window_bounds = array<i64: 2, 1024, 128>}]} {
    %c0 = arith.constant 0 : index
    %c0_0 = arith.constant 0 : index
    %c0_1 = arith.constant 0 : index
    %0 = vector.load %arg1[%c0, %c0_0, %c0_1] : memref<2x1024x128xf32, #tpu.memory_space<vmem>>, vector<2x1024x128xf32>
    %c0_2 = arith.constant 0 : index
    %c0_3 = arith.constant 0 : index
    %1 = vector.load %arg2[%c0_2, %c0_3] : memref<1024x128xf32, #tpu.memory_space<vmem>>, vector<1024x128xf32>
    %2 = vector.shape_cast %1 : vector<1024x128xf32> to vector<1x1024x128xf32>
    %3 = vector.broadcast %2 : vector<1x1024x128xf32> to vector<2x1024x128xf32>
    %4 = arith.addf %0, %3 : vector<2x1024x128xf32>
    %c0_4 = arith.constant 0 : index
    %c0_5 = arith.constant 0 : index
    %c0_6 = arith.constant 0 : index
    %5 = vector.load %arg3[%c0_4, %c0_5, %c0_6] : memref<2x1024x128xf32, #tpu.memory_space<vmem>>, vector<2x1024x128xf32>
    tpu.vector_store %arg3[%c0_4, %c0_5, %c0_6], %4 {strides = array<i32>} : memref<2x1024x128xf32, #tpu.memory_space<vmem>>, vector<2x1024x128xf32>,
    return
  }
  func.func @transform_0(%arg0: i32) -> (i32, i32, i32) {
    %c0_i32 = arith.constant 0 : i32
    %c0_i32_0 = arith.constant 0 : i32
    %c0_i32_1 = arith.constant 0 : i32
    return %arg0, %c0_i32, %c0_i32_0 : i32, i32, i32
  }
  func.func @transform_1(%arg0: i32) -> (i32, i32) {
    %c0_i32 = arith.constant 0 : i32
    %c0_i32_0 = arith.constant 0 : i32
    %c0_i32_1 = arith.constant 0 : i32
    return %c0_i32, %c0_i32_0 : i32, i32
  }
  func.func @transform_2(%arg0: i32) -> (i32, i32, i32) {
    %c0_i32 = arith.constant 0 : i32
    %c0_i32_0 = arith.constant 0 : i32
    %c0_i32_1 = arith.constant 0 : i32
    return %arg0, %c0_i32, %c0_i32_0 : i32, i32, i32
  }
}

</mosaic_0001>

<bundles_post_ra>
// kernel: tpu_custom_call.1
= control target key start
LH: loop header
LB: loop body
LE: loop exit
PB: predicated region body
PF: predicated region fallthrough
CT: control target
= control target key end

     0   :  { %7 = vsyncpa [#allocation3], 0  ;;  %s2643_s0 = inlined_call_operand.hbm [shape: f32[4,1024,128], index: 0, kind: input, shape index: {}]   ;;  %s2644_s1 = inlined_call_operand.hbm [shape: f32[1024,128], index: 1, kind: input, shape index: {}]   ;;  %s2645_s2 = inlined_call_operand.hbm [shape: f32[4,1024,128], index: 2, kind: output, shape index: {}]  }
   0x1   :  { %9 = vsyncpa [#allocation3 + $0x1], 0 }
   0x2   :  { %10 = vsyncpa [#allocation6], 0 }
   0x3   :  { %11 = vsyncpa [#allocation4], 0 }
   0x4   :  { %13 = vsyncpa [#allocation4 + $0x1], 0  ;;  %s1411_s9 = smov 0   ;;  %s1413_s10 = smov 0  }
   0x5   :  { %s1415_s11 = smov 0   ;;  %s1417_s12 = smov 0  }
   0x6 LB: > { %s1432_s13 = sadd.s32 4294967295, %s1387_s12   ;;  %s1174_s14 = sadd.s32 4294967294, %s1387_s12   ;;  %s1387_s12 = sphi %s1417_s12, %s2896_s12   ;;  %s1383_s11 = sphi %s1415_s11, %s2895_s11   ;;  %s1379_s10 = sphi %s1413_s10, %s2894_s10   ;;  %s1375_s9 = sphi %s1411_s9, %s2893_s9  }
   0x7   : > { %p39_p0 = scmp.ne.s32.totalorder %s1379_s10, %s1375_s9  ;;  %p2646_p1 = scmp.eq.s32.totalorder %s1432_s13, 0 }
   0x8   : > { %p90_p3 = scmp.eq.s32.totalorder %s1174_s14, 1  ;;  %p1175_p5 = scmp.ge.s32.totalorder %s1387_s12, 1 }
   0x9   : > { %p1441_p4 = por %p2646_p1, %p39_p0  ;;  %p97_p7 = scmp.lt.s32.totalorder %s1387_s12, 3 }
   0xa   : > { %p1446_p6 = por %p90_p3, %p39_p0  ;;  %s1389_s18 = smov [#allocation5]  }
   0xb   : > { %s2726_s15 = scalar_select %p1441_p4, 1, 0 }
   0xc   : > { %s2727_s16 = scalar_select %p1446_p6, 1, 0 }
   0xd   : > { %p1451_p8 = pnand %p1175_p5, %p97_p7  ;;  %s109_s19 = sshll.u32 %s1389_s18, 4  ;;  %s1455_s19 = int_to_ptr.vmem [resolvable:$true] %s109_s19 }
   0xe   : > { %s1467_s21 = sadd.s32 1, %s1387_s12   ;;  %s26_s22 = sadd.s32 1, %s1383_s11 }
   0xf   : > { %s2728_s17 = scalar_select %p1451_p8, 1, 0 }
  0x10   : > { %p1204_p9 = pneg %p1451_p8  ;;  %s23_s23 = ssub.s32 %s1387_s12, %s1467_s21 }
  0x11   : > { %s1259_s26 = scalar_lea.hbm %s2644_s1, 16384 }
  0x12   : > { %p1462_p11 = pnand %p1204_p9, %p2646_p1  ;;  %p1260_p12 = scmp.ne.s32.totalorder %s2644_s1, %s1259_s26 }
  0x13   : > { %p1266_p5 = scmp.lt.u32.totalorder %s1259_s26, %s2644_s1 }
  0x14   : > { %p1261_p13 = pneg %p1462_p11 }
  0x16   : > { %p1262_p0 = pnand %p1261_p13, %p1260_p12 }
  0x18   : > { %p1263_p3 = pneg %p1262_p0 }
  0x1a   : > { %p1268_p7 = pnand %p1266_p5, %p1263_p3 }
  0x1c   : > { %1271 = shalt.err (!%p1268_p7)
}
  0x1d   : > { %s1272_s3 = scalar_lea.vmem %s1455_s19, 16384  ;;  %p1280_p2 = scmp.lt.s32.totalorder %s1455_s19, %s1455_s19 }
  0x1e   : > { %p1273_p9 = scmp.ne.s32.totalorder %s1455_s19, %s1272_s3  ;;  %p1281_p6 = scmp.lt.s32.totalorder %s1272_s3, %s1272_s3 }
  0x20   : > { %p1275_p10 = pnand %p1273_p9, %p1261_p13  ;;  %p1282_p4 = por %p1281_p6, %p1280_p2 }
  0x22   : > { %p1276_p1 = pneg %p1275_p10 }
  0x24   : > { %p1283_p8 = pnand %p1282_p4, %p1276_p1 }
  0x26   : > { %1286 = shalt.err (!%p1283_p8)
}
  0x27   : > { %s1390_s4 = smov 128   ;;  %s1391_s5 = smov 8  }
  0x28   : > { %1207 = dma.hbm_to_vmem [thread:$0]  (!%p1462_p11), %s2644_s1, 16384, %s1455_s19, [#allocation6], %s1390_s4, %s1390_s4, %s1391_s5  }
  0x29   : > { %p24_p1 = scmp.eq.s32.totalorder %s23_s23, 0  ;;  %p33_p2 = scmp.ne.s32.totalorder %s1383_s11, %s1379_s10 }
  0x2a   : > { %p34_p4 = scmp.eq.s32.totalorder %s1387_s12, 0  ;;  %p1217_p6 = scmp.lt.s32.totalorder %s1387_s12, 2 }
  0x2b   : > { %s1501_s8 = scalar_select %p24_p1, %s1383_s11, %s26_s22  }
  0x2c   : > { %p35_p8 = por %p34_p4, %p33_p2  ;;  %p2730_p10 = scmp.eq.s32.totalorder %s1432_s13, 1 }
  0x2d   : > { %s123_s18 = sand.u32 1, %s1383_s11   ;;  %s1193_s20 = sshll.u32 %s1387_s12, 15 }
  0x2e   : > { %p1505_p12 = por %p2730_p10, %p33_p2  ;;  %s1178_s24 = sshll.u32 %s123_s18, 11 }
  0x2f   : > { %s1514_s27 = scalar_lea.hbm %s2643_s0, %s1193_s20  ;;  %s127_s19 = scalar_lea.vmem [#allocation2], %s1178_s24 }
  0x30   : > { %s135_s22 = sshll.u32 %s127_s19, 4  ;;  %p1516_p11 = pnand %p1217_p6, %p35_p8  ;;  %s1520_s22 = int_to_ptr.vmem [resolvable:$true] %s135_s22 }
  0x31   : > { %s1522_s28 = scalar_lea.sflag [#allocation3], %s123_s18  ;;  %s1287_s29 = scalar_lea.hbm %s1514_s27, 32768 }
  0x32   : > { %p1288_p13 = scmp.ne.s32.totalorder %s1514_s27, %s1287_s29  ;;  %p1289_p0 = pneg %p1516_p11 }
  0x33   : > { %s1292_s6 = scalar_lea.hbm %s2643_s0, 65536  ;;  %p1293_p7 = scmp.lt.u32.totalorder %s1514_s27, %s2643_s0 }
  0x34   : > { %p1290_p3 = pnand %p1289_p0, %p1288_p13  ;;  %p1294_p9 = scmp.lt.u32.totalorder %s1292_s6, %s1287_s29 }
  0x35   : > { %p1296_p2 = scmp.lt.u32.totalorder %s1287_s29, %s1514_s27 }
  0x36   : > { %p1291_p5 = pneg %p1290_p3  ;;  %p1295_p1 = por %p1294_p9, %p1293_p7 }
  0x38   : > { %p1297_p4 = por %p1296_p2, %p1295_p1 }
  0x3a   : > { %p1298_p6 = pnand %p1297_p4, %p1291_p5 }
  0x3c   : > { %1301 = shalt.err (!%p1298_p6)
}
  0x3d   : > { %s1302_s18 = scalar_lea.vmem %s1520_s22, 32768  ;;  %s1392_s24 = smov [#allocation2]  }
  0x3e   : > { %p1303_p8 = scmp.ne.s32.totalorder %s1520_s22, %s1302_s18  ;;  %s1307_s25 = sshll.u32 %s1392_s24, 4  ;;  %s1308_s25 = int_to_ptr.vmem [resolvable:$false] %s1307_s25 }
  0x3f   : > { %s1309_s26 = scalar_lea.vmem %s1308_s25, 65536  ;;  %p1310_p3 = scmp.lt.s32.totalorder %s1520_s22, %s1308_s25 }
  0x40   : > { %p1305_p10 = pnand %p1303_p8, %p1289_p0  ;;  %p1311_p7 = scmp.lt.s32.totalorder %s1309_s26, %s1302_s18 }
  0x42   : > { %p1306_p13 = pneg %p1305_p10  ;;  %p1312_p9 = por %p1311_p7, %p1310_p3 }
  0x44   : > { %p1313_p1 = pnand %p1312_p9, %p1306_p13 }
  0x46   : > { %1316 = shalt.err (!%p1313_p1)
}
  0x47   : > { %1211 = dma.hbm_to_vmem [thread:$0]  (!%p1516_p11), %s1514_s27, 32768, %s1520_s22, %s1522_s28, %s1390_s4, %s1390_s4, %s1391_s5  }
  0x48   : > { %p2733_p0 = scmp.ne.s32.totalorder %s2728_s17, 0 }
  0x4a   : > { %147 = sbr.rel (%p2733_p0) target bundleno = 306 (0x132), region = 28 }
  0x51   : > { %s1556_s19 = sand.u32 1, %s1379_s10   ;;  %p2734_p5 = scmp.ne.s32.totalorder %s2726_s15, 0 }
  0x52   : > { %s1183_s29 = sshll.u32 %s1556_s19, 11  ;;  %s150_s30 = scalar_lea.sflag [#allocation3], %s1556_s19 }
  0x53   : > { %s1560_s3 = scalar_lea.vmem [#allocation2], %s1183_s29 }
  0x54   : > { %1362 = dma.done.wait (%p2734_p5), %s150_s30, 32768  }
  0x55   : > { %1364 = vsyncadd (%p2734_p5), %s150_s30, 4294934528  ;;  %p2735_p11 = scmp.eq.s32.totalorder %s1432_s13, 0 }
  0x57   : > { %1366 = dma.done.wait (%p2735_p11), [#allocation6], 16384   ;;  %p2736_p2 = pmov %p2735_p11 }
  0x58   : > { %v180_v0 = vld [vmem:[%s1560_s3] sm:$0xff]  ;;  %v181_v2 = vld [vmem:[%s1560_s3 + $0x8] sm:$0xff]  ;;  %v182_v5 = vld [vmem:[%s1560_s3 + $0x10] sm:$0xff]  ;;  %s1580_s15 = scalar_lea.vmem [#allocation7], %s1183_s29  ;;  %s1195_s17 = sshll.u32 %s1432_s13, 15 }
  0x59   : > { %1368 = vsyncadd (%p2736_p2), [#allocation6], 4294950912  ;;  %v436_v1 = vld [vmem:[#allocation5] sm:$0xff]  ;;  %v1572_v4 = vld [vmem:[#allocation5 + $0x8] sm:$0xff]  ;;  %s1091_s4 = sshll.u32 %s1580_s15, 4  ;;  %s2583_s22 = scalar_lea.hbm %s2645_s2, %s1195_s17  ;;  %s2587_s4 = int_to_ptr.vmem [resolvable:$true] %s1091_s4 }
  0x5a   : > { %v564_v3 = vadd.f32 %v436_v1, %v180_v0  ;;  %v438_v6 = vld [vmem:[#allocation5 + $0x10] sm:$0xff]  ;;  %v565_v7 = vadd.f32 %v1572_v4, %v181_v2  ;;  %v183_v9 = vld [vmem:[%s1560_s3 + $0x18] sm:$0xff]  ;;  %v184_v11 = vld [vmem:[%s1560_s3 + $0x20] sm:$0xff]  ;;  %s1077_s13 = scalar_lea.sflag [#allocation4], %s1556_s19  ;;  %s1317_s23 = scalar_lea.vmem %s2587_s4, 32768 }
  0x5b   : > { %v566_v8 = vadd.f32 %v438_v6, %v182_v5  ;;  %v1577_v10 = vld [vmem:[#allocation5 + $0x18] sm:$0xff]  ;;  %v1584_v13 = vld [vmem:[#allocation5 + $0x20] sm:$0xff]  ;;  %v185_v14 = vld [vmem:[%s1560_s3 + $0x28] sm:$0xff]  ;;  %p1318_p4 = scmp.ne.s32.totalorder %s2587_s4, %s1317_s23  ;;  %s1393_s28 = smov [#allocation7]  }
  0x5c   : > { %820 = vst [vmem:[%s1580_s15] sm:$0xff] %v564_v3  ;;  %v567_v12 = vadd.f32 %v1577_v10, %v183_v9  ;;  %v1587_v15 = vld [vmem:[#allocation5 + $0x28] sm:$0xff]  ;;  %821 = vst [vmem:[%s1580_s15 + $0x8] sm:$0xff] %v565_v7  ;;  %v568_v16 = vadd.f32 %v1584_v13, %v184_v11  ;;  %v186_v18 = vld [vmem:[%s1560_s3 + $0x30] sm:$0xff]  ;;  %s1321_s6 = sshll.u32 %s1393_s28, 4  ;;  %s1322_s6 = int_to_ptr.vmem [resolvable:$false] %s1321_s6 }
  0x5d   : > { %822 = vst [vmem:[%s1580_s15 + $0x10] sm:$0xff] %v566_v8  ;;  %v569_v17 = vadd.f32 %v1587_v15, %v185_v14  ;;  %v1594_v19 = vld [vmem:[#allocation5 + $0x30] sm:$0xff]  ;;  %v187_v20 = vld [vmem:[%s1560_s3 + $0x38] sm:$0xff]  ;;  %v188_v23 = vld [vmem:[%s1560_s3 + $0x40] sm:$0xff]  ;;  %p1319_p6 = pnand %p1318_p4, %p1505_p12  ;;  %s1323_s7 = scalar_lea.vmem %s1322_s6, 65536 }
  0x5e   : > { %823 = vst [vmem:[%s1580_s15 + $0x18] sm:$0xff] %v567_v12  ;;  %v570_v21 = vadd.f32 %v1594_v19, %v186_v18  ;;  %v1599_v22 = vld [vmem:[#allocation5 + $0x38] sm:$0xff]  ;;  %v1602_v24 = vld [vmem:[#allocation5 + $0x40] sm:$0xff]  ;;  %824 = vst [vmem:[%s1580_s15 + $0x20] sm:$0xff] %v568_v16  ;;  %p1324_p10 = scmp.lt.s32.totalorder %s2587_s4, %s1322_s6  ;;  %p1325_p13 = scmp.lt.s32.totalorder %s1323_s7, %s1317_s23 }
  0x5f   : > { %825 = vst [vmem:[%s1580_s15 + $0x28] sm:$0xff] %v569_v17  ;;  %v571_v25 = vadd.f32 %v1599_v22, %v187_v20  ;;  %v572_v26 = vadd.f32 %v1602_v24, %v188_v23  ;;  %v189_v27 = vld [vmem:[%s1560_s3 + $0x48] sm:$0xff]  ;;  %v190_v29 = vld [vmem:[%s1560_s3 + $0x50] sm:$0xff]  ;;  %v191_v32 = vld [vmem:[%s1560_s3 + $0x58] sm:$0xff]  ;;  %p1320_p8 = pneg %p1319_p6 }
  0x60   : > { %v1609_v28 = vld [vmem:[#allocation5 + $0x48] sm:$0xff]  ;;  %826 = vst [vmem:[%s1580_s15 + $0x30] sm:$0xff] %v570_v21  ;;  %v1614_v31 = vld [vmem:[#allocation5 + $0x50] sm:$0xff]  ;;  %v1617_v33 = vld [vmem:[#allocation5 + $0x58] sm:$0xff]  ;;  %p1326_p3 = por %p1325_p13, %p1324_p10 }
  0x61   : > { %v573_v30 = vadd.f32 %v1609_v28, %v189_v27  ;;  %827 = vst [vmem:[%s1580_s15 + $0x38] sm:$0xff] %v571_v25  ;;  %828 = vst [vmem:[%s1580_s15 + $0x40] sm:$0xff] %v572_v26  ;;  %v574_v34 = vadd.f32 %v1614_v31, %v190_v29  ;;  %v575_v35 = vadd.f32 %v1617_v33, %v191_v32  ;;  %v192_v36 = vld [vmem:[%s1560_s3 + $0x60] sm:$0xff]  ;;  %v193_v38 = vld [vmem:[%s1560_s3 + $0x68] sm:$0xff] }
  0x62   : > { %v1624_v37 = vld [vmem:[#allocation5 + $0x60] sm:$0xff]  ;;  %v1629_v40 = vld [vmem:[#allocation5 + $0x68] sm:$0xff]  ;;  %v194_v41 = vld [vmem:[%s1560_s3 + $0x70] sm:$0xff]  ;;  %p1327_p7 = pnand %p1326_p3, %p1320_p8 }
  0x63   : > { %829 = vst [vmem:[%s1580_s15 + $0x48] sm:$0xff] %v573_v30  ;;  %v576_v39 = vadd.f32 %v1624_v37, %v192_v36  ;;  %v1632_v42 = vld [vmem:[#allocation5 + $0x70] sm:$0xff]  ;;  %830 = vst [vmem:[%s1580_s15 + $0x50] sm:$0xff] %v574_v34  ;;  %v577_v43 = vadd.f32 %v1629_v40, %v193_v38  ;;  %v195_v45 = vld [vmem:[%s1560_s3 + $0x78] sm:$0xff] }
  0x64   : > { %831 = vst [vmem:[%s1580_s15 + $0x58] sm:$0xff] %v575_v35  ;;  %v578_v44 = vadd.f32 %v1632_v42, %v194_v41  ;;  %v1639_v46 = vld [vmem:[#allocation5 + $0x78] sm:$0xff]  ;;  %v196_v47 = vld [vmem:[%s1560_s3 + $0x80] sm:$0xff]  ;;  %v197_v50 = vld [vmem:[%s1560_s3 + $0x88] sm:$0xff] }
  0x65   : > { %832 = vst [vmem:[%s1580_s15 + $0x60] sm:$0xff] %v576_v39  ;;  %v579_v48 = vadd.f32 %v1639_v46, %v195_v45  ;;  %v1644_v49 = vld [vmem:[#allocation5 + $0x80] sm:$0xff]  ;;  %v1647_v51 = vld [vmem:[#allocation5 + $0x88] sm:$0xff]  ;;  %833 = vst [vmem:[%s1580_s15 + $0x68] sm:$0xff] %v577_v43 }
  0x66   : > { %834 = vst [vmem:[%s1580_s15 + $0x70] sm:$0xff] %v578_v44  ;;  %v580_v52 = vadd.f32 %v1644_v49, %v196_v47  ;;  %v581_v53 = vadd.f32 %v1647_v51, %v197_v50  ;;  %v198_v54 = vld [vmem:[%s1560_s3 + $0x90] sm:$0xff]  ;;  %v199_v56 = vld [vmem:[%s1560_s3 + $0x98] sm:$0xff]  ;;  %v200_v59 = vld [vmem:[%s1560_s3 + $0xa0] sm:$0xff] }
  0x67   : > { %v1654_v55 = vld [vmem:[#allocation5 + $0x90] sm:$0xff]  ;;  %835 = vst [vmem:[%s1580_s15 + $0x78] sm:$0xff] %v579_v48  ;;  %v1659_v58 = vld [vmem:[#allocation5 + $0x98] sm:$0xff]  ;;  %v1662_v60 = vld [vmem:[#allocation5 + $0xa0] sm:$0xff] }
  0x68   : > { %v582_v57 = vadd.f32 %v1654_v55, %v198_v54  ;;  %836 = vst [vmem:[%s1580_s15 + $0x80] sm:$0xff] %v580_v52  ;;  %837 = vst [vmem:[%s1580_s15 + $0x88] sm:$0xff] %v581_v53  ;;  %v583_v61 = vadd.f32 %v1659_v58, %v199_v56  ;;  %v584_v62 = vadd.f32 %v1662_v60, %v200_v59  ;;  %v201_v63 = vld [vmem:[%s1560_s3 + $0xa8] sm:$0xff]  ;;  %v202_v1 = vld [vmem:[%s1560_s3 + $0xb0] sm:$0xff] }
  0x69   : > { %v1669_v0 = vld [vmem:[#allocation5 + $0xa8] sm:$0xff]  ;;  %v1674_v3 = vld [vmem:[#allocation5 + $0xb0] sm:$0xff]  ;;  %v203_v5 = vld [vmem:[%s1560_s3 + $0xb8] sm:$0xff] }
  0x6a   : > { %838 = vst [vmem:[%s1580_s15 + $0x90] sm:$0xff] %v582_v57  ;;  %v585_v2 = vadd.f32 %v1669_v0, %v201_v63  ;;  %v1677_v6 = vld [vmem:[#allocation5 + $0xb8] sm:$0xff]  ;;  %839 = vst [vmem:[%s1580_s15 + $0x98] sm:$0xff] %v583_v61  ;;  %v586_v7 = vadd.f32 %v1674_v3, %v202_v1  ;;  %v204_v9 = vld [vmem:[%s1560_s3 + $0xc0] sm:$0xff] }
  0x6b   : > { %840 = vst [vmem:[%s1580_s15 + $0xa0] sm:$0xff] %v584_v62  ;;  %v587_v8 = vadd.f32 %v1677_v6, %v203_v5  ;;  %v1684_v11 = vld [vmem:[#allocation5 + $0xc0] sm:$0xff]  ;;  %v205_v12 = vld [vmem:[%s1560_s3 + $0xc8] sm:$0xff]  ;;  %v206_v17 = vld [vmem:[%s1560_s3 + $0xd0] sm:$0xff] }
  0x6c   : > { %841 = vst [vmem:[%s1580_s15 + $0xa8] sm:$0xff] %v585_v2  ;;  %v588_v14 = vadd.f32 %v1684_v11, %v204_v9  ;;  %v1689_v16 = vld [vmem:[#allocation5 + $0xc8] sm:$0xff]  ;;  %v1692_v18 = vld [vmem:[#allocation5 + $0xd0] sm:$0xff]  ;;  %842 = vst [vmem:[%s1580_s15 + $0xb0] sm:$0xff] %v586_v7 }
  0x6d   : > { %843 = vst [vmem:[%s1580_s15 + $0xb8] sm:$0xff] %v587_v8  ;;  %v589_v20 = vadd.f32 %v1689_v16, %v205_v12  ;;  %v590_v21 = vadd.f32 %v1692_v18, %v206_v17  ;;  %v207_v23 = vld [vmem:[%s1560_s3 + $0xd8] sm:$0xff]  ;;  %v208_v26 = vld [vmem:[%s1560_s3 + $0xe0] sm:$0xff]  ;;  %v209_v30 = vld [vmem:[%s1560_s3 + $0xe8] sm:$0xff] }
  0x6e   : > { %v1699_v25 = vld [vmem:[#allocation5 + $0xd8] sm:$0xff]  ;;  %844 = vst [vmem:[%s1580_s15 + $0xc0] sm:$0xff] %v588_v14  ;;  %v1704_v29 = vld [vmem:[#allocation5 + $0xe0] sm:$0xff]  ;;  %v1707_v32 = vld [vmem:[#allocation5 + $0xe8] sm:$0xff] }
  0x6f   : > { %v591_v27 = vadd.f32 %v1699_v25, %v207_v23  ;;  %845 = vst [vmem:[%s1580_s15 + $0xc8] sm:$0xff] %v589_v20  ;;  %846 = vst [vmem:[%s1580_s15 + $0xd0] sm:$0xff] %v590_v21  ;;  %v592_v34 = vadd.f32 %v1704_v29, %v208_v26  ;;  %v593_v35 = vadd.f32 %v1707_v32, %v209_v30  ;;  %v210_v36 = vld [vmem:[%s1560_s3 + $0xf0] sm:$0xff]  ;;  %v211_v39 = vld [vmem:[%s1560_s3 + $0xf8] sm:$0xff] }
  0x70   : > { %v1714_v38 = vld [vmem:[#allocation5 + $0xf0] sm:$0xff]  ;;  %v1719_v43 = vld [vmem:[#allocation5 + $0xf8] sm:$0xff]  ;;  %v212_v44 = vld [vmem:[%s1560_s3 + $0x100] sm:$0xff] }
  0x71   : > { %847 = vst [vmem:[%s1580_s15 + $0xd8] sm:$0xff] %v591_v27  ;;  %v594_v41 = vadd.f32 %v1714_v38, %v210_v36  ;;  %v1722_v45 = vld [vmem:[#allocation5 + $0x100] sm:$0xff]  ;;  %848 = vst [vmem:[%s1580_s15 + $0xe0] sm:$0xff] %v592_v34  ;;  %v595_v47 = vadd.f32 %v1719_v43, %v211_v39  ;;  %v213_v50 = vld [vmem:[%s1560_s3 + $0x108] sm:$0xff] }
  0x72   : > { %849 = vst [vmem:[%s1580_s15 + $0xe8] sm:$0xff] %v593_v35  ;;  %v596_v48 = vadd.f32 %v1722_v45, %v212_v44  ;;  %v1729_v52 = vld [vmem:[#allocation5 + $0x108] sm:$0xff]  ;;  %v214_v53 = vld [vmem:[%s1560_s3 + $0x110] sm:$0xff]  ;;  %v215_v57 = vld [vmem:[%s1560_s3 + $0x118] sm:$0xff] }
  0x73   : > { %850 = vst [vmem:[%s1580_s15 + $0xf0] sm:$0xff] %v594_v41  ;;  %v597_v54 = vadd.f32 %v1729_v52, %v213_v50  ;;  %v1734_v56 = vld [vmem:[#allocation5 + $0x110] sm:$0xff]  ;;  %v1737_v59 = vld [vmem:[#allocation5 + $0x118] sm:$0xff]  ;;  %851 = vst [vmem:[%s1580_s15 + $0xf8] sm:$0xff] %v595_v47 }
  0x74   : > { %852 = vst [vmem:[%s1580_s15 + $0x100] sm:$0xff] %v596_v48  ;;  %v598_v61 = vadd.f32 %v1734_v56, %v214_v53  ;;  %v599_v62 = vadd.f32 %v1737_v59, %v215_v57  ;;  %v216_v63 = vld [vmem:[%s1560_s3 + $0x120] sm:$0xff]  ;;  %v217_v2 = vld [vmem:[%s1560_s3 + $0x128] sm:$0xff]  ;;  %v218_v8 = vld [vmem:[%s1560_s3 + $0x130] sm:$0xff] }
  0x75   : > { %v1744_v1 = vld [vmem:[#allocation5 + $0x120] sm:$0xff]  ;;  %853 = vst [vmem:[%s1580_s15 + $0x108] sm:$0xff] %v597_v54  ;;  %v1749_v7 = vld [vmem:[#allocation5 + $0x128] sm:$0xff]  ;;  %v1752_v9 = vld [vmem:[#allocation5 + $0x130] sm:$0xff] }
  0x76   : > { %v600_v5 = vadd.f32 %v1744_v1, %v216_v63  ;;  %854 = vst [vmem:[%s1580_s15 + $0x110] sm:$0xff] %v598_v61  ;;  %855 = vst [vmem:[%s1580_s15 + $0x118] sm:$0xff] %v599_v62  ;;  %v601_v12 = vadd.f32 %v1749_v7, %v217_v2  ;;  %v602_v14 = vadd.f32 %v1752_v9, %v218_v8  ;;  %v219_v17 = vld [vmem:[%s1560_s3 + $0x138] sm:$0xff]  ;;  %v220_v21 = vld [vmem:[%s1560_s3 + $0x140] sm:$0xff] }
  0x77   : > { %v1759_v20 = vld [vmem:[#allocation5 + $0x138] sm:$0xff]  ;;  %v1764_v26 = vld [vmem:[#allocation5 + $0x140] sm:$0xff]  ;;  %v221_v27 = vld [vmem:[%s1560_s3 + $0x148] sm:$0xff] }
  0x78   : > { %856 = vst [vmem:[%s1580_s15 + $0x120] sm:$0xff] %v600_v5  ;;  %v603_v23 = vadd.f32 %v1759_v20, %v219_v17  ;;  %v1767_v30 = vld [vmem:[#allocation5 + $0x148] sm:$0xff]  ;;  %857 = vst [vmem:[%s1580_s15 + $0x128] sm:$0xff] %v601_v12  ;;  %v604_v34 = vadd.f32 %v1764_v26, %v220_v21  ;;  %v222_v36 = vld [vmem:[%s1560_s3 + $0x150] sm:$0xff] }
  0x79   : > { %858 = vst [vmem:[%s1580_s15 + $0x130] sm:$0xff] %v602_v14  ;;  %v605_v35 = vadd.f32 %v1767_v30, %v221_v27  ;;  %v1774_v39 = vld [vmem:[#allocation5 + $0x150] sm:$0xff]  ;;  %v223_v41 = vld [vmem:[%s1560_s3 + $0x158] sm:$0xff]  ;;  %v224_v48 = vld [vmem:[%s1560_s3 + $0x160] sm:$0xff] }
  0x7a   : > { %859 = vst [vmem:[%s1580_s15 + $0x138] sm:$0xff] %v603_v23  ;;  %v606_v44 = vadd.f32 %v1774_v39, %v222_v36  ;;  %v1779_v47 = vld [vmem:[#allocation5 + $0x158] sm:$0xff]  ;;  %v1782_v50 = vld [vmem:[#allocation5 + $0x160] sm:$0xff]  ;;  %860 = vst [vmem:[%s1580_s15 + $0x140] sm:$0xff] %v604_v34 }
  0x7b   : > { %861 = vst [vmem:[%s1580_s15 + $0x148] sm:$0xff] %v605_v35  ;;  %v607_v53 = vadd.f32 %v1779_v47, %v223_v41  ;;  %v608_v54 = vadd.f32 %v1782_v50, %v224_v48  ;;  %v225_v57 = vld [vmem:[%s1560_s3 + $0x168] sm:$0xff]  ;;  %v226_v62 = vld [vmem:[%s1560_s3 + $0x170] sm:$0xff]  ;;  %v227_v5 = vld [vmem:[%s1560_s3 + $0x178] sm:$0xff] }
  0x7c   : > { %v1789_v61 = vld [vmem:[#allocation5 + $0x168] sm:$0xff]  ;;  %862 = vst [vmem:[%s1580_s15 + $0x150] sm:$0xff] %v606_v44  ;;  %v1794_v2 = vld [vmem:[#allocation5 + $0x170] sm:$0xff]  ;;  %v1797_v8 = vld [vmem:[#allocation5 + $0x178] sm:$0xff] }
  0x7d   : > { %v609_v63 = vadd.f32 %v1789_v61, %v225_v57  ;;  %863 = vst [vmem:[%s1580_s15 + $0x158] sm:$0xff] %v607_v53  ;;  %864 = vst [vmem:[%s1580_s15 + $0x160] sm:$0xff] %v608_v54  ;;  %v610_v12 = vadd.f32 %v1794_v2, %v226_v62  ;;  %v611_v14 = vadd.f32 %v1797_v8, %v227_v5  ;;  %v228_v17 = vld [vmem:[%s1560_s3 + $0x180] sm:$0xff]  ;;  %v229_v23 = vld [vmem:[%s1560_s3 + $0x188] sm:$0xff] }
  0x7e   : > { %v1804_v21 = vld [vmem:[#allocation5 + $0x180] sm:$0xff]  ;;  %v1809_v34 = vld [vmem:[#allocation5 + $0x188] sm:$0xff]  ;;  %v230_v35 = vld [vmem:[%s1560_s3 + $0x190] sm:$0xff] }
  0x7f   : > { %865 = vst [vmem:[%s1580_s15 + $0x168] sm:$0xff] %v609_v63  ;;  %v612_v27 = vadd.f32 %v1804_v21, %v228_v17  ;;  %v1812_v36 = vld [vmem:[#allocation5 + $0x190] sm:$0xff]  ;;  %866 = vst [vmem:[%s1580_s15 + $0x170] sm:$0xff] %v610_v12  ;;  %v613_v41 = vadd.f32 %v1809_v34, %v229_v23  ;;  %v231_v48 = vld [vmem:[%s1560_s3 + $0x198] sm:$0xff] }
  0x80   : > { %867 = vst [vmem:[%s1580_s15 + $0x178] sm:$0xff] %v611_v14  ;;  %v614_v44 = vadd.f32 %v1812_v36, %v230_v35  ;;  %v1819_v53 = vld [vmem:[#allocation5 + $0x198] sm:$0xff]  ;;  %v232_v54 = vld [vmem:[%s1560_s3 + $0x1a0] sm:$0xff]  ;;  %v233_v63 = vld [vmem:[%s1560_s3 + $0x1a8] sm:$0xff] }
  0x81   : > { %2737 = vst [vmem:[#allocation11_spill] sm:$0xff] %v1819_v53  ;;  %868 = vst [vmem:[%s1580_s15 + $0x180] sm:$0xff] %v612_v27  ;;  %v615_v57 = vadd.f32 %v1819_v53, %v231_v48  ;;  %v1824_v62 = vld [vmem:[#allocation5 + $0x1a0] sm:$0xff]  ;;  %v1827_v5 = vld [vmem:[#allocation5 + $0x1a8] sm:$0xff] }
  0x82   : > { %2738 = vst [vmem:[#allocation12_spill] sm:$0xff] %v1824_v62  ;;  %2739 = vst [vmem:[#allocation13_spill] sm:$0xff] %v1827_v5  ;;  %v616_v12 = vadd.f32 %v1824_v62, %v232_v54  ;;  %v617_v14 = vadd.f32 %v1827_v5, %v233_v63  ;;  %v234_v17 = vld [vmem:[%s1560_s3 + $0x1b0] sm:$0xff]  ;;  %v235_v27 = vld [vmem:[%s1560_s3 + $0x1b8] sm:$0xff] }
  0x83   : > { %869 = vst [vmem:[%s1580_s15 + $0x188] sm:$0xff] %v613_v41  ;;  %870 = vst [vmem:[%s1580_s15 + $0x190] sm:$0xff] %v614_v44  ;;  %v1834_v23 = vld [vmem:[#allocation5 + $0x1b0] sm:$0xff]  ;;  %v1839_v48 = vld [vmem:[#allocation5 + $0x1b8] sm:$0xff] }
  0x84   : > { %2740 = vst [vmem:[#allocation14_spill] sm:$0xff] %v1834_v23  ;;  %871 = vst [vmem:[%s1580_s15 + $0x198] sm:$0xff] %v615_v57  ;;  %v618_v35 = vadd.f32 %v1834_v23, %v234_v17  ;;  %v236_v41 = vld [vmem:[%s1560_s3 + $0x1c0] sm:$0xff]  ;;  %v619_v54 = vadd.f32 %v1839_v48, %v235_v27  ;;  %v237_v5 = vld [vmem:[%s1560_s3 + $0x1c8] sm:$0xff] }
  0x85   : > { %2741 = vst [vmem:[#allocation15_spill] sm:$0xff] %v1839_v48  ;;  %v1842_v44 = vld [vmem:[#allocation5 + $0x1c0] sm:$0xff]  ;;  %872 = vst [vmem:[%s1580_s15 + $0x1a0] sm:$0xff] %v616_v12  ;;  %v1849_v57 = vld [vmem:[#allocation5 + $0x1c8] sm:$0xff] }
  0x86   : > { %2742 = vst [vmem:[#allocation16_spill] sm:$0xff] %v1842_v44  ;;  %873 = vst [vmem:[%s1580_s15 + $0x1a8] sm:$0xff] %v617_v14  ;;  %v620_v63 = vadd.f32 %v1842_v44, %v236_v41  ;;  %v238_v17 = vld [vmem:[%s1560_s3 + $0x1d0] sm:$0xff]  ;;  %v621_v23 = vadd.f32 %v1849_v57, %v237_v5  ;;  %v239_v12 = vld [vmem:[%s1560_s3 + $0x1d8] sm:$0xff] }
  0x87   : > { %2743 = vst [vmem:[#allocation17_spill] sm:$0xff] %v1849_v57  ;;  %874 = vst [vmem:[%s1580_s15 + $0x1b0] sm:$0xff] %v618_v35  ;;  %v1854_v62 = vld [vmem:[#allocation5 + $0x1d0] sm:$0xff]  ;;  %v1857_v14 = vld [vmem:[#allocation5 + $0x1d8] sm:$0xff] }
  0x88   : > { %2744 = vst [vmem:[#allocation18_spill] sm:$0xff] %v1854_v62  ;;  %2745 = vst [vmem:[#allocation19_spill] sm:$0xff] %v1857_v14  ;;  %v622_v27 = vadd.f32 %v1854_v62, %v238_v17  ;;  %v623_v41 = vadd.f32 %v1857_v14, %v239_v12  ;;  %v240_v44 = vld [vmem:[%s1560_s3 + $0x1e0] sm:$0xff]  ;;  %v241_v5 = vld [vmem:[%s1560_s3 + $0x1e8] sm:$0xff] }
  0x89   : > { %875 = vst [vmem:[%s1580_s15 + $0x1b8] sm:$0xff] %v619_v54  ;;  %876 = vst [vmem:[%s1580_s15 + $0x1c0] sm:$0xff] %v620_v63  ;;  %v1864_v35 = vld [vmem:[#allocation5 + $0x1e0] sm:$0xff]  ;;  %v1869_v48 = vld [vmem:[#allocation5 + $0x1e8] sm:$0xff] }
  0x8a   : > { %2746 = vst [vmem:[#allocation20_spill] sm:$0xff] %v1864_v35  ;;  %877 = vst [vmem:[%s1580_s15 + $0x1c8] sm:$0xff] %v621_v23  ;;  %v624_v57 = vadd.f32 %v1864_v35, %v240_v44  ;;  %v242_v54 = vld [vmem:[%s1560_s3 + $0x1f0] sm:$0xff]  ;;  %v625_v17 = vadd.f32 %v1869_v48, %v241_v5  ;;  %v243_v14 = vld [vmem:[%s1560_s3 + $0x1f8] sm:$0xff] }
  0x8b   : > { %2747 = vst [vmem:[#allocation21_spill] sm:$0xff] %v1869_v48  ;;  %v1872_v63 = vld [vmem:[#allocation5 + $0x1f0] sm:$0xff]  ;;  %878 = vst [vmem:[%s1580_s15 + $0x1d0] sm:$0xff] %v622_v27  ;;  %v1879_v23 = vld [vmem:[#allocation5 + $0x1f8] sm:$0xff] }
  0x8c   : > { %2748 = vst [vmem:[#allocation22_spill] sm:$0xff] %v1872_v63  ;;  %879 = vst [vmem:[%s1580_s15 + $0x1d8] sm:$0xff] %v623_v41  ;;  %v626_v12 = vadd.f32 %v1872_v63, %v242_v54  ;;  %v244_v44 = vld [vmem:[%s1560_s3 + $0x200] sm:$0xff]  ;;  %v627_v35 = vadd.f32 %v1879_v23, %v243_v14  ;;  %v245_v27 = vld [vmem:[%s1560_s3 + $0x208] sm:$0xff] }
  0x8d   : > { %2749 = vst [vmem:[#allocation23_spill] sm:$0xff] %v1879_v23  ;;  %880 = vst [vmem:[%s1580_s15 + $0x1e0] sm:$0xff] %v624_v57  ;;  %v1884_v62 = vld [vmem:[#allocation5 + $0x200] sm:$0xff]  ;;  %v1887_v41 = vld [vmem:[#allocation5 + $0x208] sm:$0xff] }
  0x8e   : > { %2750 = vst [vmem:[#allocation24_spill] sm:$0xff] %v1884_v62  ;;  %2751 = vst [vmem:[#allocation25_spill] sm:$0xff] %v1887_v41  ;;  %v628_v5 = vadd.f32 %v1884_v62, %v244_v44  ;;  %v629_v54 = vadd.f32 %v1887_v41, %v245_v27  ;;  %v246_v63 = vld [vmem:[%s1560_s3 + $0x210] sm:$0xff]  ;;  %v247_v14 = vld [vmem:[%s1560_s3 + $0x218] sm:$0xff] }
  0x8f   : > { %881 = vst [vmem:[%s1580_s15 + $0x1e8] sm:$0xff] %v625_v17  ;;  %882 = vst [vmem:[%s1580_s15 + $0x1f0] sm:$0xff] %v626_v12  ;;  %v1894_v57 = vld [vmem:[#allocation5 + $0x210] sm:$0xff]  ;;  %v1899_v48 = vld [vmem:[#allocation5 + $0x218] sm:$0xff] }
  0x90   : > { %2752 = vst [vmem:[#allocation26_spill] sm:$0xff] %v1894_v57  ;;  %883 = vst [vmem:[%s1580_s15 + $0x1f8] sm:$0xff] %v627_v35  ;;  %v630_v23 = vadd.f32 %v1894_v57, %v246_v63  ;;  %v248_v17 = vld [vmem:[%s1560_s3 + $0x220] sm:$0xff]  ;;  %v631_v44 = vadd.f32 %v1899_v48, %v247_v14  ;;  %v249_v41 = vld [vmem:[%s1560_s3 + $0x228] sm:$0xff] }
  0x91   : > { %2753 = vst [vmem:[#allocation27_spill] sm:$0xff] %v1899_v48  ;;  %v1902_v12 = vld [vmem:[#allocation5 + $0x220] sm:$0xff]  ;;  %884 = vst [vmem:[%s1580_s15 + $0x200] sm:$0xff] %v628_v5  ;;  %v1909_v35 = vld [vmem:[#allocation5 + $0x228] sm:$0xff] }
  0x92   : > { %2754 = vst [vmem:[#allocation28_spill] sm:$0xff] %v1902_v12  ;;  %885 = vst [vmem:[%s1580_s15 + $0x208] sm:$0xff] %v629_v54  ;;  %v632_v27 = vadd.f32 %v1902_v12, %v248_v17  ;;  %v250_v63 = vld [vmem:[%s1560_s3 + $0x230] sm:$0xff]  ;;  %v633_v57 = vadd.f32 %v1909_v35, %v249_v41  ;;  %v251_v5 = vld [vmem:[%s1560_s3 + $0x238] sm:$0xff] }
  0x93   : > { %2755 = vst [vmem:[#allocation29_spill] sm:$0xff] %v1909_v35  ;;  %886 = vst [vmem:[%s1580_s15 + $0x210] sm:$0xff] %v630_v23  ;;  %v1914_v62 = vld [vmem:[#allocation5 + $0x230] sm:$0xff]  ;;  %v1917_v54 = vld [vmem:[#allocation5 + $0x238] sm:$0xff] }
  0x94   : > { %2756 = vst [vmem:[#allocation30_spill] sm:$0xff] %v1914_v62  ;;  %2757 = vst [vmem:[#allocation31_spill] sm:$0xff] %v1917_v54  ;;  %v634_v14 = vadd.f32 %v1914_v62, %v250_v63  ;;  %v635_v17 = vadd.f32 %v1917_v54, %v251_v5  ;;  %v252_v12 = vld [vmem:[%s1560_s3 + $0x240] sm:$0xff]  ;;  %v253_v41 = vld [vmem:[%s1560_s3 + $0x248] sm:$0xff] }
  0x95   : > { %887 = vst [vmem:[%s1580_s15 + $0x218] sm:$0xff] %v631_v44  ;;  %888 = vst [vmem:[%s1580_s15 + $0x220] sm:$0xff] %v632_v27  ;;  %v1924_v23 = vld [vmem:[#allocation5 + $0x240] sm:$0xff]  ;;  %v1929_v48 = vld [vmem:[#allocation5 + $0x248] sm:$0xff] }
  0x96   : > { %2758 = vst [vmem:[#allocation32_spill] sm:$0xff] %v1924_v23  ;;  %889 = vst [vmem:[%s1580_s15 + $0x228] sm:$0xff] %v633_v57  ;;  %v636_v35 = vadd.f32 %v1924_v23, %v252_v12  ;;  %v254_v44 = vld [vmem:[%s1560_s3 + $0x250] sm:$0xff]  ;;  %v637_v63 = vadd.f32 %v1929_v48, %v253_v41  ;;  %v255_v54 = vld [vmem:[%s1560_s3 + $0x258] sm:$0xff] }
  0x97   : > { %2759 = vst [vmem:[#allocation33_spill] sm:$0xff] %v1929_v48  ;;  %v1932_v27 = vld [vmem:[#allocation5 + $0x250] sm:$0xff]  ;;  %890 = vst [vmem:[%s1580_s15 + $0x230] sm:$0xff] %v634_v14  ;;  %v1939_v57 = vld [vmem:[#allocation5 + $0x258] sm:$0xff] }
  0x98   : > { %2760 = vst [vmem:[#allocation34_spill] sm:$0xff] %v1932_v27  ;;  %891 = vst [vmem:[%s1580_s15 + $0x238] sm:$0xff] %v635_v17  ;;  %v638_v5 = vadd.f32 %v1932_v27, %v254_v44  ;;  %v256_v12 = vld [vmem:[%s1560_s3 + $0x260] sm:$0xff]  ;;  %v639_v23 = vadd.f32 %v1939_v57, %v255_v54  ;;  %v257_v14 = vld [vmem:[%s1560_s3 + $0x268] sm:$0xff] }
  0x99   : > { %2761 = vst [vmem:[#allocation35_spill] sm:$0xff] %v1939_v57  ;;  %892 = vst [vmem:[%s1580_s15 + $0x240] sm:$0xff] %v636_v35  ;;  %v1944_v62 = vld [vmem:[#allocation5 + $0x260] sm:$0xff]  ;;  %v1947_v17 = vld [vmem:[#allocation5 + $0x268] sm:$0xff] }
  0x9a   : > { %2762 = vst [vmem:[#allocation36_spill] sm:$0xff] %v1944_v62  ;;  %2763 = vst [vmem:[#allocation37_spill] sm:$0xff] %v1947_v17  ;;  %v640_v41 = vadd.f32 %v1944_v62, %v256_v12  ;;  %v641_v44 = vadd.f32 %v1947_v17, %v257_v14  ;;  %v258_v27 = vld [vmem:[%s1560_s3 + $0x270] sm:$0xff]  ;;  %v259_v54 = vld [vmem:[%s1560_s3 + $0x278] sm:$0xff] }
  0x9b   : > { %893 = vst [vmem:[%s1580_s15 + $0x248] sm:$0xff] %v637_v63  ;;  %894 = vst [vmem:[%s1580_s15 + $0x250] sm:$0xff] %v638_v5  ;;  %v1954_v35 = vld [vmem:[#allocation5 + $0x270] sm:$0xff]  ;;  %v1959_v48 = vld [vmem:[#allocation5 + $0x278] sm:$0xff] }
  0x9c   : > { %2764 = vst [vmem:[#allocation38_spill] sm:$0xff] %v1954_v35  ;;  %895 = vst [vmem:[%s1580_s15 + $0x258] sm:$0xff] %v639_v23  ;;  %v642_v57 = vadd.f32 %v1954_v35, %v258_v27  ;;  %v260_v63 = vld [vmem:[%s1560_s3 + $0x280] sm:$0xff]  ;;  %v643_v12 = vadd.f32 %v1959_v48, %v259_v54  ;;  %v261_v17 = vld [vmem:[%s1560_s3 + $0x288] sm:$0xff] }
  0x9d   : > { %2765 = vst [vmem:[#allocation39_spill] sm:$0xff] %v1959_v48  ;;  %v1962_v5 = vld [vmem:[#allocation5 + $0x280] sm:$0xff]  ;;  %896 = vst [vmem:[%s1580_s15 + $0x260] sm:$0xff] %v640_v41  ;;  %v1969_v23 = vld [vmem:[#allocation5 + $0x288] sm:$0xff] }
  0x9e   : > { %2766 = vst [vmem:[#allocation40_spill] sm:$0xff] %v1962_v5  ;;  %897 = vst [vmem:[%s1580_s15 + $0x268] sm:$0xff] %v641_v44  ;;  %v644_v14 = vadd.f32 %v1962_v5, %v260_v63  ;;  %v262_v27 = vld [vmem:[%s1560_s3 + $0x290] sm:$0xff]  ;;  %v645_v35 = vadd.f32 %v1969_v23, %v261_v17  ;;  %v263_v41 = vld [vmem:[%s1560_s3 + $0x298] sm:$0xff] }
  0x9f   : > { %2767 = vst [vmem:[#allocation41_spill] sm:$0xff] %v1969_v23  ;;  %898 = vst [vmem:[%s1580_s15 + $0x270] sm:$0xff] %v642_v57  ;;  %v1974_v62 = vld [vmem:[#allocation5 + $0x290] sm:$0xff]  ;;  %v1977_v44 = vld [vmem:[#allocation5 + $0x298] sm:$0xff] }
  0xa0   : > { %2768 = vst [vmem:[#allocation42_spill] sm:$0xff] %v1974_v62  ;;  %2769 = vst [vmem:[#allocation43_spill] sm:$0xff] %v1977_v44  ;;  %v646_v54 = vadd.f32 %v1974_v62, %v262_v27  ;;  %v647_v63 = vadd.f32 %v1977_v44, %v263_v41  ;;  %v264_v5 = vld [vmem:[%s1560_s3 + $0x2a0] sm:$0xff]  ;;  %v265_v17 = vld [vmem:[%s1560_s3 + $0x2a8] sm:$0xff] }
  0xa1   : > { %899 = vst [vmem:[%s1580_s15 + $0x278] sm:$0xff] %v643_v12  ;;  %900 = vst [vmem:[%s1580_s15 + $0x280] sm:$0xff] %v644_v14  ;;  %v1984_v57 = vld [vmem:[#allocation5 + $0x2a0] sm:$0xff]  ;;  %v1989_v48 = vld [vmem:[#allocation5 + $0x2a8] sm:$0xff] }
  0xa2   : > { %2770 = vst [vmem:[#allocation44_spill] sm:$0xff] %v1984_v57  ;;  %901 = vst [vmem:[%s1580_s15 + $0x288] sm:$0xff] %v645_v35  ;;  %v648_v23 = vadd.f32 %v1984_v57, %v264_v5  ;;  %v266_v12 = vld [vmem:[%s1560_s3 + $0x2b0] sm:$0xff]  ;;  %v649_v27 = vadd.f32 %v1989_v48, %v265_v17  ;;  %v267_v44 = vld [vmem:[%s1560_s3 + $0x2b8] sm:$0xff] }
  0xa3   : > { %2771 = vst [vmem:[#allocation45_spill] sm:$0xff] %v1989_v48  ;;  %v1992_v14 = vld [vmem:[#allocation5 + $0x2b0] sm:$0xff]  ;;  %902 = vst [vmem:[%s1580_s15 + $0x290] sm:$0xff] %v646_v54  ;;  %v1999_v35 = vld [vmem:[#allocation5 + $0x2b8] sm:$0xff] }
  0xa4   : > { %2772 = vst [vmem:[#allocation46_spill] sm:$0xff] %v1992_v14  ;;  %903 = vst [vmem:[%s1580_s15 + $0x298] sm:$0xff] %v647_v63  ;;  %v650_v41 = vadd.f32 %v1992_v14, %v266_v12  ;;  %v268_v5 = vld [vmem:[%s1560_s3 + $0x2c0] sm:$0xff]  ;;  %v651_v57 = vadd.f32 %v1999_v35, %v267_v44  ;;  %v269_v54 = vld [vmem:[%s1560_s3 + $0x2c8] sm:$0xff] }
  0xa5   : > { %2773 = vst [vmem:[#allocation47_spill] sm:$0xff] %v1999_v35  ;;  %904 = vst [vmem:[%s1580_s15 + $0x2a0] sm:$0xff] %v648_v23  ;;  %v2004_v62 = vld [vmem:[#allocation5 + $0x2c0] sm:$0xff]  ;;  %v2007_v63 = vld [vmem:[#allocation5 + $0x2c8] sm:$0xff] }
  0xa6   : > { %2774 = vst [vmem:[#allocation48_spill] sm:$0xff] %v2004_v62  ;;  %2775 = vst [vmem:[#allocation49_spill] sm:$0xff] %v2007_v63  ;;  %v652_v17 = vadd.f32 %v2004_v62, %v268_v5  ;;  %v653_v12 = vadd.f32 %v2007_v63, %v269_v54  ;;  %v270_v14 = vld [vmem:[%s1560_s3 + $0x2d0] sm:$0xff]  ;;  %v271_v44 = vld [vmem:[%s1560_s3 + $0x2d8] sm:$0xff] }
  0xa7   : > { %905 = vst [vmem:[%s1580_s15 + $0x2a8] sm:$0xff] %v649_v27  ;;  %906 = vst [vmem:[%s1580_s15 + $0x2b0] sm:$0xff] %v650_v41  ;;  %v2014_v23 = vld [vmem:[#allocation5 + $0x2d0] sm:$0xff]  ;;  %v2019_v48 = vld [vmem:[#allocation5 + $0x2d8] sm:$0xff] }
  0xa8   : > { %2776 = vst [vmem:[#allocation50_spill] sm:$0xff] %v2014_v23  ;;  %907 = vst [vmem:[%s1580_s15 + $0x2b8] sm:$0xff] %v651_v57  ;;  %v654_v35 = vadd.f32 %v2014_v23, %v270_v14  ;;  %v272_v27 = vld [vmem:[%s1560_s3 + $0x2e0] sm:$0xff]  ;;  %v655_v5 = vadd.f32 %v2019_v48, %v271_v44  ;;  %v273_v63 = vld [vmem:[%s1560_s3 + $0x2e8] sm:$0xff] }
  0xa9   : > { %2777 = vst [vmem:[#allocation51_spill] sm:$0xff] %v2019_v48  ;;  %v2022_v41 = vld [vmem:[#allocation5 + $0x2e0] sm:$0xff]  ;;  %908 = vst [vmem:[%s1580_s15 + $0x2c0] sm:$0xff] %v652_v17  ;;  %v2029_v57 = vld [vmem:[#allocation5 + $0x2e8] sm:$0xff] }
  0xaa   : > { %2778 = vst [vmem:[#allocation52_spill] sm:$0xff] %v2022_v41  ;;  %909 = vst [vmem:[%s1580_s15 + $0x2c8] sm:$0xff] %v653_v12  ;;  %v656_v54 = vadd.f32 %v2022_v41, %v272_v27  ;;  %v274_v14 = vld [vmem:[%s1560_s3 + $0x2f0] sm:$0xff]  ;;  %v657_v23 = vadd.f32 %v2029_v57, %v273_v63  ;;  %v275_v17 = vld [vmem:[%s1560_s3 + $0x2f8] sm:$0xff] }
  0xab   : > { %2779 = vst [vmem:[#allocation53_spill] sm:$0xff] %v2029_v57  ;;  %910 = vst [vmem:[%s1580_s15 + $0x2d0] sm:$0xff] %v654_v35  ;;  %v2034_v62 = vld [vmem:[#allocation5 + $0x2f0] sm:$0xff]  ;;  %v2037_v12 = vld [vmem:[#allocation5 + $0x2f8] sm:$0xff] }
  0xac   : > { %2780 = vst [vmem:[#allocation54_spill] sm:$0xff] %v2034_v62  ;;  %2781 = vst [vmem:[#allocation55_spill] sm:$0xff] %v2037_v12  ;;  %v658_v44 = vadd.f32 %v2034_v62, %v274_v14  ;;  %v659_v27 = vadd.f32 %v2037_v12, %v275_v17  ;;  %v276_v41 = vld [vmem:[%s1560_s3 + $0x300] sm:$0xff]  ;;  %v277_v63 = vld [vmem:[%s1560_s3 + $0x308] sm:$0xff] }
  0xad   : > { %911 = vst [vmem:[%s1580_s15 + $0x2d8] sm:$0xff] %v655_v5  ;;  %912 = vst [vmem:[%s1580_s15 + $0x2e0] sm:$0xff] %v656_v54  ;;  %v2044_v35 = vld [vmem:[#allocation5 + $0x300] sm:$0xff]  ;;  %v2049_v48 = vld [vmem:[#allocation5 + $0x308] sm:$0xff] }
  0xae   : > { %2782 = vst [vmem:[#allocation56_spill] sm:$0xff] %v2044_v35  ;;  %913 = vst [vmem:[%s1580_s15 + $0x2e8] sm:$0xff] %v657_v23  ;;  %v660_v57 = vadd.f32 %v2044_v35, %v276_v41  ;;  %v278_v5 = vld [vmem:[%s1560_s3 + $0x310] sm:$0xff]  ;;  %v661_v14 = vadd.f32 %v2049_v48, %v277_v63  ;;  %v279_v12 = vld [vmem:[%s1560_s3 + $0x318] sm:$0xff] }
  0xaf   : > { %2783 = vst [vmem:[#allocation57_spill] sm:$0xff] %v2049_v48  ;;  %v2052_v54 = vld [vmem:[#allocation5 + $0x310] sm:$0xff]  ;;  %914 = vst [vmem:[%s1580_s15 + $0x2f0] sm:$0xff] %v658_v44  ;;  %v2059_v23 = vld [vmem:[#allocation5 + $0x318] sm:$0xff] }
  0xb0   : > { %2784 = vst [vmem:[#allocation58_spill] sm:$0xff] %v2052_v54  ;;  %915 = vst [vmem:[%s1580_s15 + $0x2f8] sm:$0xff] %v659_v27  ;;  %v662_v17 = vadd.f32 %v2052_v54, %v278_v5  ;;  %v280_v41 = vld [vmem:[%s1560_s3 + $0x320] sm:$0xff]  ;;  %v663_v35 = vadd.f32 %v2059_v23, %v279_v12  ;;  %v281_v44 = vld [vmem:[%s1560_s3 + $0x328] sm:$0xff] }
  0xb1   : > { %2785 = vst [vmem:[#allocation59_spill] sm:$0xff] %v2059_v23  ;;  %916 = vst [vmem:[%s1580_s15 + $0x300] sm:$0xff] %v660_v57  ;;  %v2064_v62 = vld [vmem:[#allocation5 + $0x320] sm:$0xff]  ;;  %v2067_v27 = vld [vmem:[#allocation5 + $0x328] sm:$0xff] }
  0xb2   : > { %2786 = vst [vmem:[#allocation60_spill] sm:$0xff] %v2064_v62  ;;  %2787 = vst [vmem:[#allocation61_spill] sm:$0xff] %v2067_v27  ;;  %v664_v63 = vadd.f32 %v2064_v62, %v280_v41  ;;  %v665_v5 = vadd.f32 %v2067_v27, %v281_v44  ;;  %v282_v54 = vld [vmem:[%s1560_s3 + $0x330] sm:$0xff]  ;;  %v283_v12 = vld [vmem:[%s1560_s3 + $0x338] sm:$0xff] }
  0xb3   : > { %917 = vst [vmem:[%s1580_s15 + $0x308] sm:$0xff] %v661_v14  ;;  %918 = vst [vmem:[%s1580_s15 + $0x310] sm:$0xff] %v662_v17  ;;  %v2074_v57 = vld [vmem:[#allocation5 + $0x330] sm:$0xff]  ;;  %v2079_v48 = vld [vmem:[#allocation5 + $0x338] sm:$0xff] }
  0xb4   : > { %2788 = vst [vmem:[#allocation62_spill] sm:$0xff] %v2074_v57  ;;  %919 = vst [vmem:[%s1580_s15 + $0x318] sm:$0xff] %v663_v35  ;;  %v666_v23 = vadd.f32 %v2074_v57, %v282_v54  ;;  %v284_v14 = vld [vmem:[%s1560_s3 + $0x340] sm:$0xff]  ;;  %v667_v41 = vadd.f32 %v2079_v48, %v283_v12  ;;  %v285_v27 = vld [vmem:[%s1560_s3 + $0x348] sm:$0xff] }
  0xb5   : > { %2789 = vst [vmem:[#allocation63_spill] sm:$0xff] %v2079_v48  ;;  %v2082_v17 = vld [vmem:[#allocation5 + $0x340] sm:$0xff]  ;;  %920 = vst [vmem:[%s1580_s15 + $0x320] sm:$0xff] %v664_v63  ;;  %v2089_v35 = vld [vmem:[#allocation5 + $0x348] sm:$0xff] }
  0xb6   : > { %2790 = vst [vmem:[#allocation64_spill] sm:$0xff] %v2082_v17  ;;  %921 = vst [vmem:[%s1580_s15 + $0x328] sm:$0xff] %v665_v5  ;;  %v668_v44 = vadd.f32 %v2082_v17, %v284_v14  ;;  %v286_v54 = vld [vmem:[%s1560_s3 + $0x350] sm:$0xff]  ;;  %v669_v57 = vadd.f32 %v2089_v35, %v285_v27  ;;  %v287_v63 = vld [vmem:[%s1560_s3 + $0x358] sm:$0xff] }
  0xb7   : > { %2791 = vst [vmem:[#allocation65_spill] sm:$0xff] %v2089_v35  ;;  %922 = vst [vmem:[%s1580_s15 + $0x330] sm:$0xff] %v666_v23  ;;  %v2094_v62 = vld [vmem:[#allocation5 + $0x350] sm:$0xff]  ;;  %v2097_v5 = vld [vmem:[#allocation5 + $0x358] sm:$0xff] }
  0xb8   : > { %2792 = vst [vmem:[#allocation66_spill] sm:$0xff] %v2094_v62  ;;  %2793 = vst [vmem:[#allocation67_spill] sm:$0xff] %v2097_v5  ;;  %v670_v12 = vadd.f32 %v2094_v62, %v286_v54  ;;  %v671_v14 = vadd.f32 %v2097_v5, %v287_v63  ;;  %v288_v17 = vld [vmem:[%s1560_s3 + $0x360] sm:$0xff]  ;;  %v289_v27 = vld [vmem:[%s1560_s3 + $0x368] sm:$0xff] }
  0xb9   : > { %923 = vst [vmem:[%s1580_s15 + $0x338] sm:$0xff] %v667_v41  ;;  %924 = vst [vmem:[%s1580_s15 + $0x340] sm:$0xff] %v668_v44  ;;  %v2104_v23 = vld [vmem:[#allocation5 + $0x360] sm:$0xff]  ;;  %v2109_v48 = vld [vmem:[#allocation5 + $0x368] sm:$0xff] }
  0xba   : > { %2794 = vst [vmem:[#allocation68_spill] sm:$0xff] %v2104_v23  ;;  %925 = vst [vmem:[%s1580_s15 + $0x348] sm:$0xff] %v669_v57  ;;  %v672_v35 = vadd.f32 %v2104_v23, %v288_v17  ;;  %v290_v41 = vld [vmem:[%s1560_s3 + $0x370] sm:$0xff]  ;;  %v673_v54 = vadd.f32 %v2109_v48, %v289_v27  ;;  %v291_v5 = vld [vmem:[%s1560_s3 + $0x378] sm:$0xff] }
  0xbb   : > { %2795 = vst [vmem:[#allocation69_spill] sm:$0xff] %v2109_v48  ;;  %v2112_v44 = vld [vmem:[#allocation5 + $0x370] sm:$0xff]  ;;  %926 = vst [vmem:[%s1580_s15 + $0x350] sm:$0xff] %v670_v12  ;;  %v2119_v57 = vld [vmem:[#allocation5 + $0x378] sm:$0xff] }
  0xbc   : > { %2796 = vst [vmem:[#allocation70_spill] sm:$0xff] %v2112_v44  ;;  %927 = vst [vmem:[%s1580_s15 + $0x358] sm:$0xff] %v671_v14  ;;  %v674_v63 = vadd.f32 %v2112_v44, %v290_v41  ;;  %v292_v17 = vld [vmem:[%s1560_s3 + $0x380] sm:$0xff]  ;;  %v675_v23 = vadd.f32 %v2119_v57, %v291_v5  ;;  %v293_v12 = vld [vmem:[%s1560_s3 + $0x388] sm:$0xff] }
  0xbd   : > { %2797 = vst [vmem:[#allocation71_spill] sm:$0xff] %v2119_v57  ;;  %928 = vst [vmem:[%s1580_s15 + $0x360] sm:$0xff] %v672_v35  ;;  %v2124_v62 = vld [vmem:[#allocation5 + $0x380] sm:$0xff]  ;;  %v2127_v14 = vld [vmem:[#allocation5 + $0x388] sm:$0xff] }
  0xbe   : > { %2798 = vst [vmem:[#allocation72_spill] sm:$0xff] %v2124_v62  ;;  %2799 = vst [vmem:[#allocation73_spill] sm:$0xff] %v2127_v14  ;;  %v676_v27 = vadd.f32 %v2124_v62, %v292_v17  ;;  %v677_v41 = vadd.f32 %v2127_v14, %v293_v12  ;;  %v294_v44 = vld [vmem:[%s1560_s3 + $0x390] sm:$0xff]  ;;  %v295_v5 = vld [vmem:[%s1560_s3 + $0x398] sm:$0xff] }
  0xbf   : > { %929 = vst [vmem:[%s1580_s15 + $0x368] sm:$0xff] %v673_v54  ;;  %930 = vst [vmem:[%s1580_s15 + $0x370] sm:$0xff] %v674_v63  ;;  %v2134_v35 = vld [vmem:[#allocation5 + $0x390] sm:$0xff]  ;;  %v2139_v48 = vld [vmem:[#allocation5 + $0x398] sm:$0xff] }
  0xc0   : > { %2800 = vst [vmem:[#allocation74_spill] sm:$0xff] %v2134_v35  ;;  %931 = vst [vmem:[%s1580_s15 + $0x378] sm:$0xff] %v675_v23  ;;  %v678_v57 = vadd.f32 %v2134_v35, %v294_v44  ;;  %v296_v54 = vld [vmem:[%s1560_s3 + $0x3a0] sm:$0xff]  ;;  %v679_v17 = vadd.f32 %v2139_v48, %v295_v5  ;;  %v297_v14 = vld [vmem:[%s1560_s3 + $0x3a8] sm:$0xff] }
  0xc1   : > { %2801 = vst [vmem:[#allocation75_spill] sm:$0xff] %v2139_v48  ;;  %v2142_v63 = vld [vmem:[#allocation5 + $0x3a0] sm:$0xff]  ;;  %932 = vst [vmem:[%s1580_s15 + $0x380] sm:$0xff] %v676_v27  ;;  %v2149_v23 = vld [vmem:[#allocation5 + $0x3a8] sm:$0xff] }
  0xc2   : > { %2802 = vst [vmem:[#allocation76_spill] sm:$0xff] %v2142_v63  ;;  %933 = vst [vmem:[%s1580_s15 + $0x388] sm:$0xff] %v677_v41  ;;  %v680_v12 = vadd.f32 %v2142_v63, %v296_v54  ;;  %v298_v44 = vld [vmem:[%s1560_s3 + $0x3b0] sm:$0xff]  ;;  %v681_v35 = vadd.f32 %v2149_v23, %v297_v14  ;;  %v299_v27 = vld [vmem:[%s1560_s3 + $0x3b8] sm:$0xff] }
  0xc3   : > { %2803 = vst [vmem:[#allocation77_spill] sm:$0xff] %v2149_v23  ;;  %934 = vst [vmem:[%s1580_s15 + $0x390] sm:$0xff] %v678_v57  ;;  %v2154_v62 = vld [vmem:[#allocation5 + $0x3b0] sm:$0xff]  ;;  %v2157_v41 = vld [vmem:[#allocation5 + $0x3b8] sm:$0xff] }
  0xc4   : > { %2804 = vst [vmem:[#allocation78_spill] sm:$0xff] %v2154_v62  ;;  %2805 = vst [vmem:[#allocation79_spill] sm:$0xff] %v2157_v41  ;;  %v682_v5 = vadd.f32 %v2154_v62, %v298_v44  ;;  %v683_v54 = vadd.f32 %v2157_v41, %v299_v27  ;;  %v300_v63 = vld [vmem:[%s1560_s3 + $0x3c0] sm:$0xff]  ;;  %v301_v14 = vld [vmem:[%s1560_s3 + $0x3c8] sm:$0xff] }
  0xc5   : > { %935 = vst [vmem:[%s1580_s15 + $0x398] sm:$0xff] %v679_v17  ;;  %936 = vst [vmem:[%s1580_s15 + $0x3a0] sm:$0xff] %v680_v12  ;;  %v2164_v57 = vld [vmem:[#allocation5 + $0x3c0] sm:$0xff]  ;;  %v2169_v48 = vld [vmem:[#allocation5 + $0x3c8] sm:$0xff] }
  0xc6   : > { %2806 = vst [vmem:[#allocation80_spill] sm:$0xff] %v2164_v57  ;;  %937 = vst [vmem:[%s1580_s15 + $0x3a8] sm:$0xff] %v681_v35  ;;  %v684_v23 = vadd.f32 %v2164_v57, %v300_v63  ;;  %v302_v17 = vld [vmem:[%s1560_s3 + $0x3d0] sm:$0xff]  ;;  %v685_v44 = vadd.f32 %v2169_v48, %v301_v14  ;;  %v303_v41 = vld [vmem:[%s1560_s3 + $0x3d8] sm:$0xff] }
  0xc7   : > { %2807 = vst [vmem:[#allocation81_spill] sm:$0xff] %v2169_v48  ;;  %v2172_v12 = vld [vmem:[#allocation5 + $0x3d0] sm:$0xff]  ;;  %938 = vst [vmem:[%s1580_s15 + $0x3b0] sm:$0xff] %v682_v5  ;;  %v2179_v35 = vld [vmem:[#allocation5 + $0x3d8] sm:$0xff] }
  0xc8   : > { %2808 = vst [vmem:[#allocation82_spill] sm:$0xff] %v2172_v12  ;;  %939 = vst [vmem:[%s1580_s15 + $0x3b8] sm:$0xff] %v683_v54  ;;  %v686_v27 = vadd.f32 %v2172_v12, %v302_v17  ;;  %v304_v63 = vld [vmem:[%s1560_s3 + $0x3e0] sm:$0xff]  ;;  %v687_v57 = vadd.f32 %v2179_v35, %v303_v41  ;;  %v305_v5 = vld [vmem:[%s1560_s3 + $0x3e8] sm:$0xff] }
  0xc9   : > { %2809 = vst [vmem:[#allocation83_spill] sm:$0xff] %v2179_v35  ;;  %940 = vst [vmem:[%s1580_s15 + $0x3c0] sm:$0xff] %v684_v23  ;;  %v2184_v62 = vld [vmem:[#allocation5 + $0x3e0] sm:$0xff]  ;;  %v2187_v54 = vld [vmem:[#allocation5 + $0x3e8] sm:$0xff] }
  0xca   : > { %2810 = vst [vmem:[#allocation84_spill] sm:$0xff] %v2184_v62  ;;  %2811 = vst [vmem:[#allocation85_spill] sm:$0xff] %v2187_v54  ;;  %v688_v14 = vadd.f32 %v2184_v62, %v304_v63  ;;  %v689_v17 = vadd.f32 %v2187_v54, %v305_v5  ;;  %v306_v12 = vld [vmem:[%s1560_s3 + $0x3f0] sm:$0xff]  ;;  %v307_v41 = vld [vmem:[%s1560_s3 + $0x3f8] sm:$0xff] }
  0xcb   : > { %941 = vst [vmem:[%s1580_s15 + $0x3c8] sm:$0xff] %v685_v44  ;;  %942 = vst [vmem:[%s1580_s15 + $0x3d0] sm:$0xff] %v686_v27  ;;  %v2194_v23 = vld [vmem:[#allocation5 + $0x3f0] sm:$0xff]  ;;  %v2199_v48 = vld [vmem:[#allocation5 + $0x3f8] sm:$0xff] }
  0xcc   : > { %2812 = vst [vmem:[#allocation86_spill] sm:$0xff] %v2194_v23  ;;  %943 = vst [vmem:[%s1580_s15 + $0x3d8] sm:$0xff] %v687_v57  ;;  %v690_v35 = vadd.f32 %v2194_v23, %v306_v12  ;;  %v308_v53 = vld [vmem:[%s1560_s3 + $0x400] sm:$0xff]  ;;  %v309_v44 = vld [vmem:[%s1560_s3 + $0x408] sm:$0xff]  ;;  %v691_v27 = vadd.f32 %v2199_v48, %v307_v41 }
  0xcd   : > { %2813 = vst [vmem:[#allocation87_spill] sm:$0xff] %v2199_v48  ;;  %944 = vst [vmem:[%s1580_s15 + $0x3e0] sm:$0xff] %v688_v14  ;;  %v1257_v63 = vld [vmem:[#allocation5] sm:$0xff]  ;;  %v693_v57 = vadd.f32 %v1572_v4, %v309_v44  ;;  %v310_v54 = vld [vmem:[%s1560_s3 + $0x410] sm:$0xff] }
  0xce   : > { %945 = vst [vmem:[%s1580_s15 + $0x3e8] sm:$0xff] %v689_v17  ;;  %v692_v5 = vadd.f32 %v1257_v63, %v308_v53  ;;  %v311_v12 = vld [vmem:[%s1560_s3 + $0x418] sm:$0xff]  ;;  %v312_v23 = vld [vmem:[%s1560_s3 + $0x420] sm:$0xff]  ;;  %946 = vst [vmem:[%s1580_s15 + $0x3f0] sm:$0xff] %v690_v35 }
  0xcf   : > { %v1258_v62 = vld [vmem:[#allocation5 + $0x10] sm:$0xff]  ;;  %v695_v17 = vadd.f32 %v1577_v10, %v311_v12  ;;  %v696_v41 = vadd.f32 %v1584_v13, %v312_v23  ;;  %v313_v48 = vld [vmem:[%s1560_s3 + $0x428] sm:$0xff]  ;;  %v315_v63 = vld [vmem:[%s1560_s3 + $0x438] sm:$0xff]  ;;  %947 = vst [vmem:[%s1580_s15 + $0x3f8] sm:$0xff] %v691_v27 }
  0xd0   : > { %v694_v14 = vadd.f32 %v1258_v62, %v310_v54  ;;  %v314_v53 = vld [vmem:[%s1560_s3 + $0x430] sm:$0xff]  ;;  %948 = vst [vmem:[%s1580_s15 + $0x400] sm:$0xff] %v692_v5  ;;  %949 = vst [vmem:[%s1580_s15 + $0x408] sm:$0xff] %v693_v57  ;;  %v697_v4 = vadd.f32 %v1587_v15, %v313_v48  ;;  %v699_v10 = vadd.f32 %v1599_v22, %v315_v63  ;;  %v316_v35 = vld [vmem:[%s1560_s3 + $0x440] sm:$0xff] }
  0xd1   : > { %v698_v62 = vadd.f32 %v1594_v19, %v314_v53  ;;  %v317_v13 = vld [vmem:[%s1560_s3 + $0x448] sm:$0xff]  ;;  %v318_v54 = vld [vmem:[%s1560_s3 + $0x450] sm:$0xff]  ;;  %951 = vst [vmem:[%s1580_s15 + $0x418] sm:$0xff] %v695_v17  ;;  %952 = vst [vmem:[%s1580_s15 + $0x420] sm:$0xff] %v696_v41  ;;  %v700_v23 = vadd.f32 %v1602_v24, %v316_v35 }
  0xd2   : > { %950 = vst [vmem:[%s1580_s15 + $0x410] sm:$0xff] %v694_v14  ;;  %v701_v15 = vadd.f32 %v1609_v28, %v317_v13  ;;  %v702_v19 = vadd.f32 %v1614_v31, %v318_v54  ;;  %v319_v48 = vld [vmem:[%s1560_s3 + $0x458] sm:$0xff]  ;;  %v320_v22 = vld [vmem:[%s1560_s3 + $0x460] sm:$0xff]  ;;  %v321_v44 = vld [vmem:[%s1560_s3 + $0x468] sm:$0xff] }
  0xd3   : > { %953 = vst [vmem:[%s1580_s15 + $0x428] sm:$0xff] %v697_v4  ;;  %954 = vst [vmem:[%s1580_s15 + $0x430] sm:$0xff] %v698_v62  ;;  %v703_v27 = vadd.f32 %v1617_v33, %v319_v48  ;;  %v704_v24 = vadd.f32 %v1624_v37, %v320_v22  ;;  %v705_v28 = vadd.f32 %v1629_v40, %v321_v44  ;;  %v322_v5 = vld [vmem:[%s1560_s3 + $0x470] sm:$0xff]  ;;  %v323_v31 = vld [vmem:[%s1560_s3 + $0x478] sm:$0xff] }
  0xd4   : > { %955 = vst [vmem:[%s1580_s15 + $0x438] sm:$0xff] %v699_v10  ;;  %v324_v57 = vld [vmem:[%s1560_s3 + $0x480] sm:$0xff]  ;;  %956 = vst [vmem:[%s1580_s15 + $0x440] sm:$0xff] %v700_v23  ;;  %v706_v12 = vadd.f32 %v1632_v42, %v322_v5  ;;  %v707_v33 = vadd.f32 %v1639_v46, %v323_v31  ;;  %v325_v14 = vld [vmem:[%s1560_s3 + $0x488] sm:$0xff] }
  0xd5   : > { %957 = vst [vmem:[%s1580_s15 + $0x448] sm:$0xff] %v701_v15  ;;  %958 = vst [vmem:[%s1580_s15 + $0x450] sm:$0xff] %v702_v19  ;;  %v708_v37 = vadd.f32 %v1644_v49, %v324_v57  ;;  %v326_v40 = vld [vmem:[%s1560_s3 + $0x490] sm:$0xff]  ;;  %v327_v17 = vld [vmem:[%s1560_s3 + $0x498] sm:$0xff]  ;;  %v709_v41 = vadd.f32 %v1647_v51, %v325_v14 }
  0xd6   : > { %959 = vst [vmem:[%s1580_s15 + $0x458] sm:$0xff] %v703_v27  ;;  %960 = vst [vmem:[%s1580_s15 + $0x460] sm:$0xff] %v704_v24  ;;  %v710_v42 = vadd.f32 %v1654_v55, %v326_v40  ;;  %v711_v46 = vadd.f32 %v1659_v58, %v327_v17  ;;  %v328_v53 = vld [vmem:[%s1560_s3 + $0x4a0] sm:$0xff]  ;;  %v329_v49 = vld [vmem:[%s1560_s3 + $0x4a8] sm:$0xff] }
  0xd7   : > { %961 = vst [vmem:[%s1580_s15 + $0x468] sm:$0xff] %v705_v28  ;;  %v330_v63 = vld [vmem:[%s1560_s3 + $0x4b0] sm:$0xff]  ;;  %962 = vst [vmem:[%s1580_s15 + $0x470] sm:$0xff] %v706_v12  ;;  %v712_v4 = vadd.f32 %v1662_v60, %v328_v53  ;;  %v713_v51 = vadd.f32 %v1669_v0, %v329_v49  ;;  %v331_v62 = vld [vmem:[%s1560_s3 + $0x4b8] sm:$0xff] }
  0xd8   : > { %963 = vst [vmem:[%s1580_s15 + $0x478] sm:$0xff] %v707_v33  ;;  %964 = vst [vmem:[%s1580_s15 + $0x480] sm:$0xff] %v708_v37  ;;  %v714_v55 = vadd.f32 %v1674_v3, %v330_v63  ;;  %v332_v58 = vld [vmem:[%s1560_s3 + $0x4c0] sm:$0xff]  ;;  %v333_v10 = vld [vmem:[%s1560_s3 + $0x4c8] sm:$0xff]  ;;  %v715_v35 = vadd.f32 %v1677_v6, %v331_v62 }
  0xd9   : > { %965 = vst [vmem:[%s1580_s15 + $0x488] sm:$0xff] %v709_v41  ;;  %966 = vst [vmem:[%s1580_s15 + $0x490] sm:$0xff] %v710_v42  ;;  %v716_v60 = vadd.f32 %v1684_v11, %v332_v58  ;;  %v717_v0 = vadd.f32 %v1689_v16, %v333_v10  ;;  %v334_v13 = vld [vmem:[%s1560_s3 + $0x4d0] sm:$0xff]  ;;  %v335_v3 = vld [vmem:[%s1560_s3 + $0x4d8] sm:$0xff] }
  0xda   : > { %967 = vst [vmem:[%s1580_s15 + $0x498] sm:$0xff] %v711_v46  ;;  %v336_v54 = vld [vmem:[%s1560_s3 + $0x4e0] sm:$0xff]  ;;  %968 = vst [vmem:[%s1580_s15 + $0x4a0] sm:$0xff] %v712_v4  ;;  %v718_v23 = vadd.f32 %v1692_v18, %v334_v13  ;;  %v719_v6 = vadd.f32 %v1699_v25, %v335_v3  ;;  %v337_v15 = vld [vmem:[%s1560_s3 + $0x4e8] sm:$0xff] }
  0xdb   : > { %969 = vst [vmem:[%s1580_s15 + $0x4a8] sm:$0xff] %v713_v51  ;;  %970 = vst [vmem:[%s1580_s15 + $0x4b0] sm:$0xff] %v714_v55  ;;  %v720_v11 = vadd.f32 %v1704_v29, %v336_v54  ;;  %v338_v16 = vld [vmem:[%s1560_s3 + $0x4f0] sm:$0xff]  ;;  %v339_v19 = vld [vmem:[%s1560_s3 + $0x4f8] sm:$0xff]  ;;  %v721_v48 = vadd.f32 %v1707_v32, %v337_v15 }
  0xdc   : > { %971 = vst [vmem:[%s1580_s15 + $0x4b8] sm:$0xff] %v715_v35  ;;  %972 = vst [vmem:[%s1580_s15 + $0x4c0] sm:$0xff] %v716_v60  ;;  %v722_v18 = vadd.f32 %v1714_v38, %v338_v16  ;;  %v723_v25 = vadd.f32 %v1719_v43, %v339_v19  ;;  %v340_v22 = vld [vmem:[%s1560_s3 + $0x500] sm:$0xff]  ;;  %v341_v29 = vld [vmem:[%s1560_s3 + $0x508] sm:$0xff] }
  0xdd   : > { %973 = vst [vmem:[%s1580_s15 + $0x4c8] sm:$0xff] %v717_v0  ;;  %v342_v44 = vld [vmem:[%s1560_s3 + $0x510] sm:$0xff]  ;;  %974 = vst [vmem:[%s1580_s15 + $0x4d0] sm:$0xff] %v718_v23  ;;  %v724_v27 = vadd.f32 %v1722_v45, %v340_v22  ;;  %v725_v32 = vadd.f32 %v1729_v52, %v341_v29  ;;  %v343_v24 = vld [vmem:[%s1560_s3 + $0x518] sm:$0xff] }
  0xde   : > { %975 = vst [vmem:[%s1580_s15 + $0x4d8] sm:$0xff] %v719_v6  ;;  %976 = vst [vmem:[%s1580_s15 + $0x4e0] sm:$0xff] %v720_v11  ;;  %v726_v38 = vadd.f32 %v1734_v56, %v342_v44  ;;  %v344_v43 = vld [vmem:[%s1560_s3 + $0x520] sm:$0xff]  ;;  %v345_v28 = vld [vmem:[%s1560_s3 + $0x528] sm:$0xff]  ;;  %v727_v5 = vadd.f32 %v1737_v59, %v343_v24 }
  0xdf   : > { %977 = vst [vmem:[%s1580_s15 + $0x4e8] sm:$0xff] %v721_v48  ;;  %978 = vst [vmem:[%s1580_s15 + $0x4f0] sm:$0xff] %v722_v18  ;;  %v728_v45 = vadd.f32 %v1744_v1, %v344_v43  ;;  %v729_v52 = vadd.f32 %v1749_v7, %v345_v28  ;;  %v346_v31 = vld [vmem:[%s1560_s3 + $0x530] sm:$0xff]  ;;  %v347_v56 = vld [vmem:[%s1560_s3 + $0x538] sm:$0xff] }
  0xe0   : > { %979 = vst [vmem:[%s1580_s15 + $0x4f8] sm:$0xff] %v723_v25  ;;  %v348_v57 = vld [vmem:[%s1560_s3 + $0x540] sm:$0xff]  ;;  %980 = vst [vmem:[%s1580_s15 + $0x500] sm:$0xff] %v724_v27  ;;  %v730_v12 = vadd.f32 %v1752_v9, %v346_v31  ;;  %v731_v59 = vadd.f32 %v1759_v20, %v347_v56  ;;  %v349_v33 = vld [vmem:[%s1560_s3 + $0x548] sm:$0xff] }
  0xe1   : > { %981 = vst [vmem:[%s1580_s15 + $0x508] sm:$0xff] %v725_v32  ;;  %982 = vst [vmem:[%s1580_s15 + $0x510] sm:$0xff] %v726_v38  ;;  %v732_v1 = vadd.f32 %v1764_v26, %v348_v57  ;;  %v350_v7 = vld [vmem:[%s1560_s3 + $0x550] sm:$0xff]  ;;  %v351_v37 = vld [vmem:[%s1560_s3 + $0x558] sm:$0xff]  ;;  %v733_v14 = vadd.f32 %v1767_v30, %v349_v33 }
  0xe2   : > { %983 = vst [vmem:[%s1580_s15 + $0x518] sm:$0xff] %v727_v5  ;;  %984 = vst [vmem:[%s1580_s15 + $0x520] sm:$0xff] %v728_v45  ;;  %v734_v9 = vadd.f32 %v1774_v39, %v350_v7  ;;  %v735_v20 = vadd.f32 %v1779_v47, %v351_v37  ;;  %v352_v40 = vld [vmem:[%s1560_s3 + $0x560] sm:$0xff]  ;;  %v353_v26 = vld [vmem:[%s1560_s3 + $0x568] sm:$0xff] }
  0xe3   : > { %985 = vst [vmem:[%s1580_s15 + $0x528] sm:$0xff] %v729_v52  ;;  %v354_v17 = vld [vmem:[%s1560_s3 + $0x570] sm:$0xff]  ;;  %986 = vst [vmem:[%s1580_s15 + $0x530] sm:$0xff] %v730_v12  ;;  %v736_v41 = vadd.f32 %v1782_v50, %v352_v40  ;;  %v737_v30 = vadd.f32 %v1789_v61, %v353_v26  ;;  %v355_v42 = vld [vmem:[%s1560_s3 + $0x578] sm:$0xff] }
  0xe4   : > { %987 = vst [vmem:[%s1580_s15 + $0x538] sm:$0xff] %v731_v59  ;;  %988 = vst [vmem:[%s1580_s15 + $0x540] sm:$0xff] %v732_v1  ;;  %v738_v39 = vadd.f32 %v1794_v2, %v354_v17  ;;  %v356_v47 = vld [vmem:[%s1560_s3 + $0x580] sm:$0xff]  ;;  %v357_v46 = vld [vmem:[%s1560_s3 + $0x588] sm:$0xff]  ;;  %v739_v53 = vadd.f32 %v1797_v8, %v355_v42 }
  0xe5   : > { %989 = vst [vmem:[%s1580_s15 + $0x548] sm:$0xff] %v733_v14  ;;  %990 = vst [vmem:[%s1580_s15 + $0x550] sm:$0xff] %v734_v9  ;;  %v740_v50 = vadd.f32 %v1804_v21, %v356_v47  ;;  %v741_v61 = vadd.f32 %v1809_v34, %v357_v46  ;;  %v358_v49 = vld [vmem:[%s1560_s3 + $0x590] sm:$0xff]  ;;  %v359_v2 = vld [vmem:[%s1560_s3 + $0x598] sm:$0xff] }
  0xe6   : > { %991 = vst [vmem:[%s1580_s15 + $0x558] sm:$0xff] %v735_v20  ;;  %v360_v63 = vld [vmem:[%s1560_s3 + $0x5a0] sm:$0xff]  ;;  %992 = vst [vmem:[%s1580_s15 + $0x560] sm:$0xff] %v736_v41  ;;  %v742_v4 = vadd.f32 %v1812_v36, %v358_v49  ;;  %v2815_v55 = vld [vmem:[#allocation12_spill] sm:$0xff] }
  0xe7   : > { %993 = vst [vmem:[%s1580_s15 + $0x568] sm:$0xff] %v737_v30  ;;  %994 = vst [vmem:[%s1580_s15 + $0x570] sm:$0xff] %v738_v39  ;;  %v2814_v51 = vld [vmem:[#allocation11_spill] sm:$0xff]  ;;  %v744_v21 = vadd.f32 %v2815_v55, %v360_v63  ;;  %v361_v62 = vld [vmem:[%s1560_s3 + $0x5a8] sm:$0xff] }
  0xe8   : > { %v743_v8 = vadd.f32 %v2814_v51, %v359_v2  ;;  %v362_v34 = vld [vmem:[%s1560_s3 + $0x5b0] sm:$0xff]  ;;  %v363_v58 = vld [vmem:[%s1560_s3 + $0x5b8] sm:$0xff]  ;;  %995 = vst [vmem:[%s1580_s15 + $0x578] sm:$0xff] %v739_v53  ;;  %996 = vst [vmem:[%s1580_s15 + $0x580] sm:$0xff] %v740_v50 }
  0xe9   : > { %997 = vst [vmem:[%s1580_s15 + $0x588] sm:$0xff] %v741_v61  ;;  %v2816_v10 = vld [vmem:[#allocation13_spill] sm:$0xff]  ;;  %v2817_v60 = vld [vmem:[#allocation14_spill] sm:$0xff]  ;;  %v2818_v0 = vld [vmem:[#allocation15_spill] sm:$0xff] }
  0xea   : > { %v745_v35 = vadd.f32 %v2816_v10, %v361_v62  ;;  %v746_v36 = vadd.f32 %v2817_v60, %v362_v34  ;;  %v747_v13 = vadd.f32 %v2818_v0, %v363_v58  ;;  %v364_v3 = vld [vmem:[%s1560_s3 + $0x5c0] sm:$0xff]  ;;  %v365_v54 = vld [vmem:[%s1560_s3 + $0x5c8] sm:$0xff]  ;;  %v366_v23 = vld [vmem:[%s1560_s3 + $0x5d0] sm:$0xff]  ;;  %998 = vst [vmem:[%s1580_s15 + $0x590] sm:$0xff] %v742_v4 }
  0xeb   : > { %999 = vst [vmem:[%s1580_s15 + $0x598] sm:$0xff] %v743_v8  ;;  %1000 = vst [vmem:[%s1580_s15 + $0x5a0] sm:$0xff] %v744_v21  ;;  %v2819_v6 = vld [vmem:[#allocation16_spill] sm:$0xff]  ;;  %v2820_v15 = vld [vmem:[#allocation17_spill] sm:$0xff] }
  0xec   : > { %v748_v11 = vadd.f32 %v2819_v6, %v364_v3  ;;  %v749_v16 = vadd.f32 %v2820_v15, %v365_v54  ;;  %v2821_v19 = vld [vmem:[#allocation18_spill] sm:$0xff]  ;;  %v368_v25 = vld [vmem:[%s1560_s3 + $0x5e0] sm:$0xff]  ;;  %v369_v22 = vld [vmem:[%s1560_s3 + $0x5e8] sm:$0xff]  ;;  %1001 = vst [vmem:[%s1580_s15 + $0x5a8] sm:$0xff] %v745_v35 }
  0xed   : > { %v750_v48 = vadd.f32 %v2821_v19, %v366_v23  ;;  %v367_v18 = vld [vmem:[%s1560_s3 + $0x5d8] sm:$0xff]  ;;  %1002 = vst [vmem:[%s1580_s15 + $0x5b0] sm:$0xff] %v746_v36  ;;  %1003 = vst [vmem:[%s1580_s15 + $0x5b8] sm:$0xff] %v747_v13  ;;  %v2822_v29 = vld [vmem:[#allocation19_spill] sm:$0xff] }
  0xee   : > { %v751_v44 = vadd.f32 %v2822_v29, %v367_v18  ;;  %v2823_v27 = vld [vmem:[#allocation20_spill] sm:$0xff]  ;;  %v2824_v38 = vld [vmem:[#allocation21_spill] sm:$0xff]  ;;  %v371_v28 = vld [vmem:[%s1560_s3 + $0x5f8] sm:$0xff]  ;;  %1004 = vst [vmem:[%s1580_s15 + $0x5c0] sm:$0xff] %v748_v11 }
  0xef   : > { %v752_v32 = vadd.f32 %v2823_v27, %v368_v25  ;;  %v753_v24 = vadd.f32 %v2824_v38, %v369_v22  ;;  %v370_v43 = vld [vmem:[%s1560_s3 + $0x5f0] sm:$0xff]  ;;  %v372_v5 = vld [vmem:[%s1560_s3 + $0x600] sm:$0xff]  ;;  %1005 = vst [vmem:[%s1580_s15 + $0x5c8] sm:$0xff] %v749_v16  ;;  %1006 = vst [vmem:[%s1580_s15 + $0x5d0] sm:$0xff] %v750_v48 }
  0xf0   : > { %v2825_v45 = vld [vmem:[#allocation22_spill] sm:$0xff]  ;;  %v2826_v31 = vld [vmem:[#allocation23_spill] sm:$0xff]  ;;  %v2827_v57 = vld [vmem:[#allocation24_spill] sm:$0xff]  ;;  %1007 = vst [vmem:[%s1580_s15 + $0x5d8] sm:$0xff] %v751_v44 }
  0xf1   : > { %v754_v52 = vadd.f32 %v2825_v45, %v370_v43  ;;  %v755_v56 = vadd.f32 %v2826_v31, %v371_v28  ;;  %v756_v12 = vadd.f32 %v2827_v57, %v372_v5  ;;  %v373_v59 = vld [vmem:[%s1560_s3 + $0x608] sm:$0xff]  ;;  %v374_v1 = vld [vmem:[%s1560_s3 + $0x610] sm:$0xff]  ;;  %v375_v33 = vld [vmem:[%s1560_s3 + $0x618] sm:$0xff]  ;;  %1008 = vst [vmem:[%s1580_s15 + $0x5e0] sm:$0xff] %v752_v32 }
  0xf2   : > { %1009 = vst [vmem:[%s1580_s15 + $0x5e8] sm:$0xff] %v753_v24  ;;  %v2828_v7 = vld [vmem:[#allocation25_spill] sm:$0xff]  ;;  %v2829_v14 = vld [vmem:[#allocation26_spill] sm:$0xff]  ;;  %v2830_v20 = vld [vmem:[#allocation27_spill] sm:$0xff] }
  0xf3   : > { %v757_v37 = vadd.f32 %v2828_v7, %v373_v59  ;;  %v758_v9 = vadd.f32 %v2829_v14, %v374_v1  ;;  %v759_v40 = vadd.f32 %v2830_v20, %v375_v33  ;;  %v376_v26 = vld [vmem:[%s1560_s3 + $0x620] sm:$0xff]  ;;  %v377_v17 = vld [vmem:[%s1560_s3 + $0x628] sm:$0xff]  ;;  %v378_v41 = vld [vmem:[%s1560_s3 + $0x630] sm:$0xff]  ;;  %1010 = vst [vmem:[%s1580_s15 + $0x5f0] sm:$0xff] %v754_v52 }
  0xf4   : > { %1011 = vst [vmem:[%s1580_s15 + $0x5f8] sm:$0xff] %v755_v56  ;;  %1012 = vst [vmem:[%s1580_s15 + $0x600] sm:$0xff] %v756_v12  ;;  %v2831_v30 = vld [vmem:[#allocation28_spill] sm:$0xff]  ;;  %v2832_v42 = vld [vmem:[#allocation29_spill] sm:$0xff] }
  0xf5   : > { %v760_v39 = vadd.f32 %v2831_v30, %v376_v26  ;;  %v761_v47 = vadd.f32 %v2832_v42, %v377_v17  ;;  %v2833_v46 = vld [vmem:[#allocation30_spill] sm:$0xff]  ;;  %v380_v61 = vld [vmem:[%s1560_s3 + $0x640] sm:$0xff]  ;;  %v381_v49 = vld [vmem:[%s1560_s3 + $0x648] sm:$0xff]  ;;  %1013 = vst [vmem:[%s1580_s15 + $0x608] sm:$0xff] %v757_v37 }
  0xf6   : > { %v762_v53 = vadd.f32 %v2833_v46, %v378_v41  ;;  %v379_v50 = vld [vmem:[%s1560_s3 + $0x638] sm:$0xff]  ;;  %1014 = vst [vmem:[%s1580_s15 + $0x610] sm:$0xff] %v758_v9  ;;  %1015 = vst [vmem:[%s1580_s15 + $0x618] sm:$0xff] %v759_v40  ;;  %v2834_v2 = vld [vmem:[#allocation31_spill] sm:$0xff] }
  0xf7   : > { %v763_v63 = vadd.f32 %v2834_v2, %v379_v50  ;;  %v2835_v4 = vld [vmem:[#allocation32_spill] sm:$0xff]  ;;  %v2836_v8 = vld [vmem:[#allocation33_spill] sm:$0xff]  ;;  %v383_v62 = vld [vmem:[%s1560_s3 + $0x658] sm:$0xff]  ;;  %1016 = vst [vmem:[%s1580_s15 + $0x620] sm:$0xff] %v760_v39 }
  0xf8   : > { %v764_v51 = vadd.f32 %v2835_v4, %v380_v61  ;;  %v765_v55 = vadd.f32 %v2836_v8, %v381_v49  ;;  %v382_v21 = vld [vmem:[%s1560_s3 + $0x650] sm:$0xff]  ;;  %v384_v34 = vld [vmem:[%s1560_s3 + $0x660] sm:$0xff]  ;;  %1017 = vst [vmem:[%s1580_s15 + $0x628] sm:$0xff] %v761_v47  ;;  %1018 = vst [vmem:[%s1580_s15 + $0x630] sm:$0xff] %v762_v53 }
  0xf9   : > { %v2837_v58 = vld [vmem:[#allocation34_spill] sm:$0xff]  ;;  %v2838_v35 = vld [vmem:[#allocation35_spill] sm:$0xff]  ;;  %v2839_v36 = vld [vmem:[#allocation36_spill] sm:$0xff]  ;;  %1019 = vst [vmem:[%s1580_s15 + $0x638] sm:$0xff] %v763_v63 }
  0xfa   : > { %v766_v10 = vadd.f32 %v2837_v58, %v382_v21  ;;  %v767_v60 = vadd.f32 %v2838_v35, %v383_v62  ;;  %v768_v0 = vadd.f32 %v2839_v36, %v384_v34  ;;  %v385_v13 = vld [vmem:[%s1560_s3 + $0x668] sm:$0xff]  ;;  %v386_v3 = vld [vmem:[%s1560_s3 + $0x670] sm:$0xff]  ;;  %v387_v54 = vld [vmem:[%s1560_s3 + $0x678] sm:$0xff]  ;;  %1020 = vst [vmem:[%s1580_s15 + $0x640] sm:$0xff] %v764_v51 }
  0xfb   : > { %1021 = vst [vmem:[%s1580_s15 + $0x648] sm:$0xff] %v765_v55  ;;  %v2840_v23 = vld [vmem:[#allocation37_spill] sm:$0xff]  ;;  %v2841_v11 = vld [vmem:[#allocation38_spill] sm:$0xff]  ;;  %v2842_v16 = vld [vmem:[#allocation39_spill] sm:$0xff] }
  0xfc   : > { %v769_v6 = vadd.f32 %v2840_v23, %v385_v13  ;;  %v770_v15 = vadd.f32 %v2841_v11, %v386_v3  ;;  %v771_v19 = vadd.f32 %v2842_v16, %v387_v54  ;;  %v388_v48 = vld [vmem:[%s1560_s3 + $0x680] sm:$0xff]  ;;  %v389_v18 = vld [vmem:[%s1560_s3 + $0x688] sm:$0xff]  ;;  %v390_v25 = vld [vmem:[%s1560_s3 + $0x690] sm:$0xff]  ;;  %1022 = vst [vmem:[%s1580_s15 + $0x650] sm:$0xff] %v766_v10 }
  0xfd   : > { %1023 = vst [vmem:[%s1580_s15 + $0x658] sm:$0xff] %v767_v60  ;;  %1024 = vst [vmem:[%s1580_s15 + $0x660] sm:$0xff] %v768_v0  ;;  %v2843_v22 = vld [vmem:[#allocation40_spill] sm:$0xff]  ;;  %v2844_v44 = vld [vmem:[#allocation41_spill] sm:$0xff] }
  0xfe   : > { %v772_v29 = vadd.f32 %v2843_v22, %v388_v48  ;;  %v773_v27 = vadd.f32 %v2844_v44, %v389_v18  ;;  %v2845_v32 = vld [vmem:[#allocation42_spill] sm:$0xff]  ;;  %v392_v43 = vld [vmem:[%s1560_s3 + $0x6a0] sm:$0xff]  ;;  %v393_v28 = vld [vmem:[%s1560_s3 + $0x6a8] sm:$0xff]  ;;  %1025 = vst [vmem:[%s1580_s15 + $0x668] sm:$0xff] %v769_v6 }
  0xff   : > { %v774_v38 = vadd.f32 %v2845_v32, %v390_v25  ;;  %v391_v24 = vld [vmem:[%s1560_s3 + $0x698] sm:$0xff]  ;;  %1026 = vst [vmem:[%s1580_s15 + $0x670] sm:$0xff] %v770_v15  ;;  %1027 = vst [vmem:[%s1580_s15 + $0x678] sm:$0xff] %v771_v19  ;;  %v2846_v5 = vld [vmem:[#allocation43_spill] sm:$0xff] }
 0x100   : > { %v775_v45 = vadd.f32 %v2846_v5, %v391_v24  ;;  %v2847_v52 = vld [vmem:[#allocation44_spill] sm:$0xff]  ;;  %v2848_v56 = vld [vmem:[#allocation45_spill] sm:$0xff]  ;;  %v395_v59 = vld [vmem:[%s1560_s3 + $0x6b8] sm:$0xff]  ;;  %1028 = vst [vmem:[%s1580_s15 + $0x680] sm:$0xff] %v772_v29 }
 0x101   : > { %v776_v31 = vadd.f32 %v2847_v52, %v392_v43  ;;  %v777_v57 = vadd.f32 %v2848_v56, %v393_v28  ;;  %v394_v12 = vld [vmem:[%s1560_s3 + $0x6b0] sm:$0xff]  ;;  %v396_v1 = vld [vmem:[%s1560_s3 + $0x6c0] sm:$0xff]  ;;  %1029 = vst [vmem:[%s1580_s15 + $0x688] sm:$0xff] %v773_v27  ;;  %1030 = vst [vmem:[%s1580_s15 + $0x690] sm:$0xff] %v774_v38 }
 0x102   : > { %v2849_v33 = vld [vmem:[#allocation46_spill] sm:$0xff]  ;;  %v2850_v37 = vld [vmem:[#allocation47_spill] sm:$0xff]  ;;  %v2851_v9 = vld [vmem:[#allocation48_spill] sm:$0xff]  ;;  %1031 = vst [vmem:[%s1580_s15 + $0x698] sm:$0xff] %v775_v45 }
 0x103   : > { %v778_v7 = vadd.f32 %v2849_v33, %v394_v12  ;;  %v779_v14 = vadd.f32 %v2850_v37, %v395_v59  ;;  %v780_v20 = vadd.f32 %v2851_v9, %v396_v1  ;;  %v397_v40 = vld [vmem:[%s1560_s3 + $0x6c8] sm:$0xff]  ;;  %v398_v26 = vld [vmem:[%s1560_s3 + $0x6d0] sm:$0xff]  ;;  %v399_v17 = vld [vmem:[%s1560_s3 + $0x6d8] sm:$0xff]  ;;  %1032 = vst [vmem:[%s1580_s15 + $0x6a0] sm:$0xff] %v776_v31 }
 0x104   : > { %1033 = vst [vmem:[%s1580_s15 + $0x6a8] sm:$0xff] %v777_v57  ;;  %v2852_v41 = vld [vmem:[#allocation49_spill] sm:$0xff]  ;;  %v2853_v39 = vld [vmem:[#allocation50_spill] sm:$0xff]  ;;  %v2854_v47 = vld [vmem:[#allocation51_spill] sm:$0xff] }
 0x105   : > { %v781_v30 = vadd.f32 %v2852_v41, %v397_v40  ;;  %v782_v42 = vadd.f32 %v2853_v39, %v398_v26  ;;  %v783_v46 = vadd.f32 %v2854_v47, %v399_v17  ;;  %v400_v53 = vld [vmem:[%s1560_s3 + $0x6e0] sm:$0xff]  ;;  %v401_v50 = vld [vmem:[%s1560_s3 + $0x6e8] sm:$0xff]  ;;  %v402_v61 = vld [vmem:[%s1560_s3 + $0x6f0] sm:$0xff]  ;;  %1034 = vst [vmem:[%s1580_s15 + $0x6b0] sm:$0xff] %v778_v7 }
 0x106   : > { %1035 = vst [vmem:[%s1580_s15 + $0x6b8] sm:$0xff] %v779_v14  ;;  %1036 = vst [vmem:[%s1580_s15 + $0x6c0] sm:$0xff] %v780_v20  ;;  %v2855_v49 = vld [vmem:[#allocation52_spill] sm:$0xff]  ;;  %v2856_v63 = vld [vmem:[#allocation53_spill] sm:$0xff] }
 0x107   : > { %v784_v2 = vadd.f32 %v2855_v49, %v400_v53  ;;  %v785_v4 = vadd.f32 %v2856_v63, %v401_v50  ;;  %v2857_v51 = vld [vmem:[#allocation54_spill] sm:$0xff]  ;;  %v404_v21 = vld [vmem:[%s1560_s3 + $0x700] sm:$0xff]  ;;  %v405_v62 = vld [vmem:[%s1560_s3 + $0x708] sm:$0xff]  ;;  %1037 = vst [vmem:[%s1580_s15 + $0x6c8] sm:$0xff] %v781_v30 }
 0x108   : > { %v786_v8 = vadd.f32 %v2857_v51, %v402_v61  ;;  %v403_v55 = vld [vmem:[%s1560_s3 + $0x6f8] sm:$0xff]  ;;  %1038 = vst [vmem:[%s1580_s15 + $0x6d0] sm:$0xff] %v782_v42  ;;  %1039 = vst [vmem:[%s1580_s15 + $0x6d8] sm:$0xff] %v783_v46  ;;  %v2858_v34 = vld [vmem:[#allocation55_spill] sm:$0xff] }
 0x109   : > { %v787_v58 = vadd.f32 %v2858_v34, %v403_v55  ;;  %v2859_v10 = vld [vmem:[#allocation56_spill] sm:$0xff]  ;;  %v2860_v60 = vld [vmem:[#allocation57_spill] sm:$0xff]  ;;  %v407_v13 = vld [vmem:[%s1560_s3 + $0x718] sm:$0xff]  ;;  %1040 = vst [vmem:[%s1580_s15 + $0x6e0] sm:$0xff] %v784_v2 }
 0x10a   : > { %v788_v35 = vadd.f32 %v2859_v10, %v404_v21  ;;  %v789_v36 = vadd.f32 %v2860_v60, %v405_v62  ;;  %v406_v0 = vld [vmem:[%s1560_s3 + $0x710] sm:$0xff]  ;;  %v408_v3 = vld [vmem:[%s1560_s3 + $0x720] sm:$0xff]  ;;  %1041 = vst [vmem:[%s1580_s15 + $0x6e8] sm:$0xff] %v785_v4  ;;  %1042 = vst [vmem:[%s1580_s15 + $0x6f0] sm:$0xff] %v786_v8 }
 0x10b   : > { %v2861_v54 = vld [vmem:[#allocation58_spill] sm:$0xff]  ;;  %v2862_v6 = vld [vmem:[#allocation59_spill] sm:$0xff]  ;;  %v2863_v15 = vld [vmem:[#allocation60_spill] sm:$0xff]  ;;  %1043 = vst [vmem:[%s1580_s15 + $0x6f8] sm:$0xff] %v787_v58 }
 0x10c   : > { %v790_v23 = vadd.f32 %v2861_v54, %v406_v0  ;;  %v791_v11 = vadd.f32 %v2862_v6, %v407_v13  ;;  %v792_v16 = vadd.f32 %v2863_v15, %v408_v3  ;;  %v409_v19 = vld [vmem:[%s1560_s3 + $0x728] sm:$0xff]  ;;  %v410_v48 = vld [vmem:[%s1560_s3 + $0x730] sm:$0xff]  ;;  %v411_v18 = vld [vmem:[%s1560_s3 + $0x738] sm:$0xff]  ;;  %1044 = vst [vmem:[%s1580_s15 + $0x700] sm:$0xff] %v788_v35 }
 0x10d   : > { %1045 = vst [vmem:[%s1580_s15 + $0x708] sm:$0xff] %v789_v36  ;;  %v2864_v25 = vld [vmem:[#allocation61_spill] sm:$0xff]  ;;  %v2865_v29 = vld [vmem:[#allocation62_spill] sm:$0xff]  ;;  %v2866_v27 = vld [vmem:[#allocation63_spill] sm:$0xff] }
 0x10e   : > { %v793_v22 = vadd.f32 %v2864_v25, %v409_v19  ;;  %v794_v44 = vadd.f32 %v2865_v29, %v410_v48  ;;  %v795_v32 = vadd.f32 %v2866_v27, %v411_v18  ;;  %v412_v38 = vld [vmem:[%s1560_s3 + $0x740] sm:$0xff]  ;;  %v413_v24 = vld [vmem:[%s1560_s3 + $0x748] sm:$0xff]  ;;  %v414_v43 = vld [vmem:[%s1560_s3 + $0x750] sm:$0xff]  ;;  %1046 = vst [vmem:[%s1580_s15 + $0x710] sm:$0xff] %v790_v23 }
 0x10f   : > { %1047 = vst [vmem:[%s1580_s15 + $0x718] sm:$0xff] %v791_v11  ;;  %1048 = vst [vmem:[%s1580_s15 + $0x720] sm:$0xff] %v792_v16  ;;  %v2867_v28 = vld [vmem:[#allocation64_spill] sm:$0xff]  ;;  %v2868_v45 = vld [vmem:[#allocation65_spill] sm:$0xff] }
 0x110   : > { %v796_v5 = vadd.f32 %v2867_v28, %v412_v38  ;;  %v797_v52 = vadd.f32 %v2868_v45, %v413_v24  ;;  %v2869_v31 = vld [vmem:[#allocation66_spill] sm:$0xff]  ;;  %v416_v12 = vld [vmem:[%s1560_s3 + $0x760] sm:$0xff]  ;;  %v417_v59 = vld [vmem:[%s1560_s3 + $0x768] sm:$0xff]  ;;  %1049 = vst [vmem:[%s1580_s15 + $0x728] sm:$0xff] %v793_v22 }
 0x111   : > { %v798_v56 = vadd.f32 %v2869_v31, %v414_v43  ;;  %v415_v57 = vld [vmem:[%s1560_s3 + $0x758] sm:$0xff]  ;;  %1050 = vst [vmem:[%s1580_s15 + $0x730] sm:$0xff] %v794_v44  ;;  %1051 = vst [vmem:[%s1580_s15 + $0x738] sm:$0xff] %v795_v32  ;;  %v2870_v1 = vld [vmem:[#allocation67_spill] sm:$0xff] }
 0x112   : > { %v799_v33 = vadd.f32 %v2870_v1, %v415_v57  ;;  %v2871_v7 = vld [vmem:[#allocation68_spill] sm:$0xff]  ;;  %v2872_v14 = vld [vmem:[#allocation69_spill] sm:$0xff]  ;;  %v419_v40 = vld [vmem:[%s1560_s3 + $0x778] sm:$0xff]  ;;  %1052 = vst [vmem:[%s1580_s15 + $0x740] sm:$0xff] %v796_v5 }
 0x113   : > { %v800_v37 = vadd.f32 %v2871_v7, %v416_v12  ;;  %v801_v9 = vadd.f32 %v2872_v14, %v417_v59  ;;  %v418_v20 = vld [vmem:[%s1560_s3 + $0x770] sm:$0xff]  ;;  %v420_v26 = vld [vmem:[%s1560_s3 + $0x780] sm:$0xff]  ;;  %1053 = vst [vmem:[%s1580_s15 + $0x748] sm:$0xff] %v797_v52  ;;  %1054 = vst [vmem:[%s1580_s15 + $0x750] sm:$0xff] %v798_v56 }
 0x114   : > { %v2873_v17 = vld [vmem:[#allocation70_spill] sm:$0xff]  ;;  %v2874_v30 = vld [vmem:[#allocation71_spill] sm:$0xff]  ;;  %v2875_v42 = vld [vmem:[#allocation72_spill] sm:$0xff]  ;;  %1055 = vst [vmem:[%s1580_s15 + $0x758] sm:$0xff] %v799_v33 }
 0x115   : > { %v802_v41 = vadd.f32 %v2873_v17, %v418_v20  ;;  %v803_v39 = vadd.f32 %v2874_v30, %v419_v40  ;;  %v804_v47 = vadd.f32 %v2875_v42, %v420_v26  ;;  %v421_v46 = vld [vmem:[%s1560_s3 + $0x788] sm:$0xff]  ;;  %v422_v53 = vld [vmem:[%s1560_s3 + $0x790] sm:$0xff]  ;;  %v423_v50 = vld [vmem:[%s1560_s3 + $0x798] sm:$0xff]  ;;  %1056 = vst [vmem:[%s1580_s15 + $0x760] sm:$0xff] %v800_v37 }
 0x116   : > { %1057 = vst [vmem:[%s1580_s15 + $0x768] sm:$0xff] %v801_v9  ;;  %v2876_v61 = vld [vmem:[#allocation73_spill] sm:$0xff]  ;;  %v2877_v2 = vld [vmem:[#allocation74_spill] sm:$0xff]  ;;  %v2878_v4 = vld [vmem:[#allocation75_spill] sm:$0xff] }
 0x117   : > { %v805_v49 = vadd.f32 %v2876_v61, %v421_v46  ;;  %v806_v63 = vadd.f32 %v2877_v2, %v422_v53  ;;  %v807_v51 = vadd.f32 %v2878_v4, %v423_v50  ;;  %v424_v8 = vld [vmem:[%s1560_s3 + $0x7a0] sm:$0xff]  ;;  %v425_v55 = vld [vmem:[%s1560_s3 + $0x7a8] sm:$0xff]  ;;  %v426_v21 = vld [vmem:[%s1560_s3 + $0x7b0] sm:$0xff]  ;;  %1058 = vst [vmem:[%s1580_s15 + $0x770] sm:$0xff] %v802_v41 }
 0x118   : > { %1059 = vst [vmem:[%s1580_s15 + $0x778] sm:$0xff] %v803_v39  ;;  %1060 = vst [vmem:[%s1580_s15 + $0x780] sm:$0xff] %v804_v47  ;;  %v2879_v62 = vld [vmem:[#allocation76_spill] sm:$0xff]  ;;  %v2880_v58 = vld [vmem:[#allocation77_spill] sm:$0xff] }
 0x119   : > { %v808_v34 = vadd.f32 %v2879_v62, %v424_v8  ;;  %v809_v10 = vadd.f32 %v2880_v58, %v425_v55  ;;  %v2881_v35 = vld [vmem:[#allocation78_spill] sm:$0xff]  ;;  %v428_v0 = vld [vmem:[%s1560_s3 + $0x7c0] sm:$0xff]  ;;  %v429_v13 = vld [vmem:[%s1560_s3 + $0x7c8] sm:$0xff]  ;;  %1061 = vst [vmem:[%s1580_s15 + $0x788] sm:$0xff] %v805_v49 }
 0x11a   : > { %v810_v60 = vadd.f32 %v2881_v35, %v426_v21  ;;  %v427_v36 = vld [vmem:[%s1560_s3 + $0x7b8] sm:$0xff]  ;;  %1062 = vst [vmem:[%s1580_s15 + $0x790] sm:$0xff] %v806_v63  ;;  %1063 = vst [vmem:[%s1580_s15 + $0x798] sm:$0xff] %v807_v51  ;;  %v2882_v3 = vld [vmem:[#allocation79_spill] sm:$0xff] }
 0x11b   : > { %v811_v54 = vadd.f32 %v2882_v3, %v427_v36  ;;  %v2883_v23 = vld [vmem:[#allocation80_spill] sm:$0xff]  ;;  %v2884_v11 = vld [vmem:[#allocation81_spill] sm:$0xff]  ;;  %v431_v19 = vld [vmem:[%s1560_s3 + $0x7d8] sm:$0xff]  ;;  %1064 = vst [vmem:[%s1580_s15 + $0x7a0] sm:$0xff] %v808_v34 }
 0x11c   : > { %v812_v6 = vadd.f32 %v2883_v23, %v428_v0  ;;  %v813_v15 = vadd.f32 %v2884_v11, %v429_v13  ;;  %v430_v16 = vld [vmem:[%s1560_s3 + $0x7d0] sm:$0xff]  ;;  %v432_v48 = vld [vmem:[%s1560_s3 + $0x7e0] sm:$0xff]  ;;  %1065 = vst [vmem:[%s1580_s15 + $0x7a8] sm:$0xff] %v809_v10  ;;  %1066 = vst [vmem:[%s1580_s15 + $0x7b0] sm:$0xff] %v810_v60 }
 0x11d   : > { %v2885_v18 = vld [vmem:[#allocation82_spill] sm:$0xff]  ;;  %v2886_v22 = vld [vmem:[#allocation83_spill] sm:$0xff]  ;;  %v2887_v44 = vld [vmem:[#allocation84_spill] sm:$0xff]  ;;  %1067 = vst [vmem:[%s1580_s15 + $0x7b8] sm:$0xff] %v811_v54 }
 0x11e   : > { %v814_v25 = vadd.f32 %v2885_v18, %v430_v16  ;;  %v815_v29 = vadd.f32 %v2886_v22, %v431_v19  ;;  %v816_v27 = vadd.f32 %v2887_v44, %v432_v48  ;;  %v433_v32 = vld [vmem:[%s1560_s3 + $0x7e8] sm:$0xff]  ;;  %v434_v38 = vld [vmem:[%s1560_s3 + $0x7f0] sm:$0xff]  ;;  %v435_v24 = vld [vmem:[%s1560_s3 + $0x7f8] sm:$0xff]  ;;  %1068 = vst [vmem:[%s1580_s15 + $0x7c0] sm:$0xff] %v812_v6 }
 0x11f   : > { %1069 = vst [vmem:[%s1580_s15 + $0x7c8] sm:$0xff] %v813_v15  ;;  %v2888_v43 = vld [vmem:[#allocation85_spill] sm:$0xff]  ;;  %v2889_v5 = vld [vmem:[#allocation86_spill] sm:$0xff]  ;;  %v2890_v52 = vld [vmem:[#allocation87_spill] sm:$0xff] }
 0x120   : > { %v817_v28 = vadd.f32 %v2888_v43, %v433_v32  ;;  %v818_v45 = vadd.f32 %v2889_v5, %v434_v38  ;;  %v819_v31 = vadd.f32 %v2890_v52, %v435_v24  ;;  %1070 = vst [vmem:[%s1580_s15 + $0x7d0] sm:$0xff] %v814_v25  ;;  %1071 = vst [vmem:[%s1580_s15 + $0x7d8] sm:$0xff] %v815_v29 }
 0x121   : > { %1072 = vst [vmem:[%s1580_s15 + $0x7e0] sm:$0xff] %v816_v27 }
 0x122   : > { %1073 = vst [vmem:[%s1580_s15 + $0x7e8] sm:$0xff] %v817_v28  ;;  %1074 = vst [vmem:[%s1580_s15 + $0x7f0] sm:$0xff] %v818_v45 }
 0x123   : > { %1075 = vst [vmem:[%s1580_s15 + $0x7f8] sm:$0xff] %v819_v31 }
 0x124   : > { %1330 = shalt.err (!%p1327_p7)
}
 0x125   : > { %s1331_s20 = scalar_lea.hbm %s2583_s22, 32768  ;;  %s1335_s25 = scalar_lea.hbm %s2645_s2, 65536 }
 0x126   : > { %p1332_p9 = scmp.ne.s32.totalorder %s2583_s22, %s1331_s20  ;;  %p1336_p5 = scmp.lt.u32.totalorder %s2583_s22, %s2645_s2 }
 0x127   : > { %p1337_p11 = scmp.lt.u32.totalorder %s1335_s25, %s1331_s20  ;;  %p1339_p4 = scmp.lt.u32.totalorder %s1331_s20, %s2583_s22 }
 0x128   : > { %p1333_p1 = pnand %p1332_p9, %p1505_p12 }
 0x129   : > { %p1338_p2 = por %p1337_p11, %p1336_p5 }
 0x12a   : > { %p1334_p0 = pneg %p1333_p1 }
 0x12b   : > { %p1340_p6 = por %p1339_p4, %p1338_p2 }
 0x12d   : > { %p1341_p8 = pnand %p1340_p6, %p1334_p0 }
 0x12f   : > { %1344 = shalt.err (!%p1341_p8)
}
 0x130   : > { %s1394_s30 = smov 128   ;;  %s1395_s3 = smov 8  }
 0x131   : > { %1202 = dma.vmem_to_hbm [thread:$0]  (%p1505_p12), %s2587_s4, 32768, %s2583_s22, %s1077_s13, %s1394_s30, %s1394_s30, %s1395_s3  }
 0x132 PF: > { %s1106_s15 = sand.u32 1, %s1375_s9   ;;  %p2891_p10 = scmp.ne.s32.totalorder %s2727_s16, 0 }
 0x133   : > { %p2892_p13 = scmp.ge.s32.totalorder %s1387_s12, 2  ;;  %s1107_s17 = scalar_lea.sflag [#allocation4], %s1106_s15 }
 0x135   : > { %p1213_p3 = pnand %p2892_p13, %p2891_p10 }
 0x137   : > { %1370 = dma.done.wait (!%p1213_p3), %s1107_s17, 32768  }
 0x138   : > { %1372 = vsyncadd (!%p1213_p3), %s1107_s17, 4294934528  ;;  %p16_p7 = scmp.ge.s32.totalorder %s1467_s21, 4   ;;  %s2893_s9 = smov %s1379_s10 }
 0x139   : > { %s2894_s10 = smov %s1383_s11  ;;  %s2895_s11 = smov %s1501_s8 }
 0x13a   : > { %s2896_s12 = smov %s1467_s21  ;;  %18 = sbr.rel (!%p16_p7) target bundleno = 6 (0x6), region = 77 }
 0x141   :  { %1112 = vsyncpa [#allocation3], 1 }
 0x142   :  { %1114 = vsyncpa [#allocation3 + $0x1], 1 }
 0x143   :  { %1115 = vsyncpa [#allocation6], 1 }
 0x144   :  { %1116 = vsyncpa [#allocation4], 1 }
 0x145   :  { %1118 = vsyncpa [#allocation4 + $0x1], 1 }

</bundles_post_ra>
